<compile_context>
chip_gen: v7x
topology: tpu7x:2x2x1
jax: 0.10.0
libtpu: 0.0.40
codegen_flags: <defaults>
</compile_context>

<pallas_src>
import math
from functools import partial

import jax
import jax.numpy as jnp
from jax.experimental import pallas as pl
from jax.experimental.pallas import tpu as pltpu

NEG_INF = -1e30                 # large negative; exp() underflows to exactly 0 (f32 mask math)
WEIGHT_DTYPE = jnp.bfloat16     # weight matrices + MXU operands in bf16, accumulation in f32


def _vmem_limit_bytes():
    """Scoped VMEM limit ~75% of physical, capped at 96 MiB (v7x has only 64 MiB/TC -> 48 MiB)."""
    try:
        cap = getattr(pltpu.get_tpu_info(), "vmem_capacity_bytes", None)
    except Exception:
        cap = None
    if not cap:
        cap = 64 * 1024 * 1024
    return int(min(96 * 1024 * 1024, 0.75 * cap))


def _layernorm(x, w, b, eps=1e-5):
    mu = jnp.mean(x, axis=-1, keepdims=True)
    xc = x - mu
    var = jnp.mean(xc * xc, axis=-1, keepdims=True)
    return xc * jax.lax.rsqrt(var + eps) * w + b


def _pick_tile(dim, target, align):
    """Largest multiple of `align` that divides dim and is <= target; fall back to full dim."""
    t = min(dim, target)
    t -= t % align
    while t >= align:
        if dim % t == 0:
            return t
        t -= align
    return dim


# ----------------------------------------------------------------------------- kernels

def fused_encoder_kernel(seqlen, nheads, head_dim,
                         x_ref, bias_ref,
                         wqkv_ref, wo_ref, w1_ref, w2_ref,
                         bqkv_ref, small_ref, b1_ref,
                         o_ref, act_ref):
    """All nlayers TransformerEncoderLayers for one batch element, fused in one pallas_call.

    grid=(nbatch, nlayers); batch axis "parallel" (independent rows -> megacore on v7x),
    layer axis "arbitrary" (sequential). Per-layer weight blocks are indexed by the layer id
    so auto-pipelining prefetches layer l+1 weights under layer l compute, while the (S, H)
    activation stays resident in the VMEM scratch `act_ref`. The x/bias blocks are indexed
    only by the batch id, so they are DMA'd once per batch (not per layer).
    """
    layer = pl.program_id(1)
    H = nheads * head_dim
    cdt = wqkv_ref.dtype                        # bf16 compute dtype for MXU operands

    @pl.when(layer == 0)
    def _():
        act_ref[...] = x_ref[0]                 # load embeddings into the resident buffer

    x = act_ref[...]                            # (S, H) f32

    # Packed small per-layer params: rows [bo, ln1_w, ln1_b, b2, ln2_w, ln2_b, pad, pad].
    sp = small_ref[0]                           # (8, H) f32
    bo, ln1w, ln1b = sp[0:1], sp[1:2], sp[2:3]
    b2, ln2w, ln2b = sp[3:4], sp[4:5], sp[5:6]

    # ---- multi-head self-attention -------------------------------------------------------
    # Fused QKV projection (1/sqrt(head_dim) already folded into the Wq columns at init).
    qkv = jnp.dot(x.astype(cdt), wqkv_ref[0],
                  preferred_element_type=jnp.float32) + bqkv_ref[0]           # (S, 3H) f32

    # Head split via static lane slices + stack (avoids in-kernel minor-dim reshape/transpose
    # relayouts); the slices are tiny compared to the matmuls.
    d = head_dim
    q = jnp.stack([qkv[:, h * d:(h + 1) * d] for h in range(nheads)])         # (n, S, d)
    k = jnp.stack([qkv[:, H + h * d:H + (h + 1) * d] for h in range(nheads)])
    v = jnp.stack([qkv[:, 2 * H + h * d:2 * H + (h + 1) * d] for h in range(nheads)])

    # Scores / context with bf16 MXU operands, f32 accumulation.
    s = jnp.einsum('nqd,nkd->nqk', q.astype(cdt), k.astype(cdt),
                   preferred_element_type=jnp.float32) + bias_ref[0][None]    # (n, S, S)
    s = s - jnp.max(s, axis=-1, keepdims=True)
    p = jnp.exp(s)
    # approx reciprocal hits the EUP slot; small relative error vs exact divide (inference OK).
    p = p * pl.reciprocal(jnp.sum(p, axis=-1, keepdims=True), approx=True)
    ctx = jnp.einsum('nqk,nkd->nqd', p.astype(cdt), v.astype(cdt),
                     preferred_element_type=jnp.float32)                      # (n, S, d)

    # Re-pack heads (concat along features, PyTorch order) and apply a single out-projection.
    ctx2 = jnp.concatenate([ctx[h] for h in range(nheads)], axis=-1)          # (S, H)
    attn = jnp.dot(ctx2.astype(cdt), wo_ref[0],
                   preferred_element_type=jnp.float32) + bo                   # (S, H)

    x = _layernorm(x + attn, ln1w, ln1b)        # post-norm residual 1

    # ---- feed-forward (ReLU), bf16 operands, f32 accumulation -----------------------------
    # TODO(synk): tile the FFN over dff (extra grid axis / emit_pipeline) if w1/w2 double
    # buffers get tight against v7x's 48 MiB scoped VMEM at large H*dff.
    h1 = jnp.maximum(
        jnp.dot(x.astype(cdt), w1_ref[0], preferred_element_type=jnp.float32) + b1_ref[0],
        0.0)
    ff = jnp.dot(h1.astype(cdt), w2_ref[0], preferred_element_type=jnp.float32) + b2
    x = _layernorm(x + ff, ln2w, ln2b)          # post-norm residual 2

    act_ref[...] = x

    @pl.when(layer == pl.num_programs(1) - 1)
    def _():
        o_ref[0] = x


def vocab_proj_kernel(x_ref, w_ref, b_ref, o_ref):
    x = x_ref[...].astype(w_ref.dtype)
    o_ref[...] = (jnp.dot(x, w_ref[...], preferred_element_type=jnp.float32)
                  + b_ref[...])


# ----------------------------------------------------------------------------- wrappers

def transformer_encoder(x, bias, layers, nheads):
    """x: (N, S, H) f32 embeddings; bias: (N, S, S) f32 additive mask; layers: stacked weights."""
    N, S, H = x.shape
    head_dim = H // nheads
    nlayers = layers["wqkv"].shape[0]

    names = ["wqkv", "wo", "w1", "w2", "bqkv", "small", "b1"]

    def wspec(name):
        shp = layers[name].shape
        return pl.BlockSpec((1,) + tuple(shp[1:]),
                            lambda b, l: (l,) + (0,) * (len(shp) - 1))

    # TODO(synk): flash-style key tiling of the (nheads,S,S) scores for very long sequences;
    # optional pipeline_mode=pl.Buffered(3) on w1/w2 if weight DMA is exposed on v5e.
    return pl.pallas_call(
        partial(fused_encoder_kernel, S, nheads, head_dim),
        out_shape=jax.ShapeDtypeStruct((N, S, H), jnp.float32),
        grid=(N, nlayers),
        in_specs=[pl.BlockSpec((1, S, H), lambda b, l: (b, 0, 0)),   # embedded tokens
                  pl.BlockSpec((1, S, S), lambda b, l: (b, 0, 0))]   # causal+pad additive bias
                 + [wspec(n) for n in names],
        out_specs=pl.BlockSpec((1, S, H), lambda b, l: (b, 0, 0)),   # resident output block
        scratch_shapes=[pltpu.VMEM((S, H), jnp.float32)],            # resident activation
        compiler_params=pltpu.CompilerParams(
            dimension_semantics=("parallel", "arbitrary"),
            vmem_limit_bytes=_vmem_limit_bytes()),
    )(x, bias, *[layers[n] for n in names])


def output_projection(x2d, w_t, b, *, tile_m=512, tile_v=1024):
    """Tiled logits = x @ W_out^T + b; robust tile choice (divisor-aligned, full-dim fallback)."""
    M, H = x2d.shape
    V = w_t.shape[1]
    tm = _pick_tile(M, tile_m, 8)
    tv = _pick_tile(V, tile_v, 128)
    return pl.pallas_call(
        vocab_proj_kernel,
        out_shape=jax.ShapeDtypeStruct((M, V), jnp.float32),
        grid=(M // tm, V // tv),
        in_specs=[pl.BlockSpec((tm, H), lambda i, j: (i, 0)),
                  pl.BlockSpec((H, tv), lambda i, j: (0, j)),
                  pl.BlockSpec((1, tv), lambda i, j: (0, j))],
        out_specs=pl.BlockSpec((tm, tv), lambda i, j: (i, j)),
        compiler_params=pltpu.CompilerParams(
            dimension_semantics=("parallel", "parallel"),
            vmem_limit_bytes=_vmem_limit_bytes()),
    )(x2d, w_t, b)


def init_params(key, vocab_size, hidden_size, nlayers, nheads, dff, max_window_size, pad_value):
    assert hidden_size % nheads == 0
    head_dim = hidden_size // nheads
    scale = 1.0 / math.sqrt(head_dim)

    def init(k, shape, s=0.02):
        return (s * jax.random.normal(k, shape)).astype(jnp.float32)

    keys = iter(jax.random.split(key, 3 + 4 * nlayers))

    # nn.Embedding(..., padding_idx=pad_value): row `pad_value` is zero. The reference model
    # passes padding_idx to the positional embedding too, so that positional row is zero.
    word_emb = init(next(keys), (vocab_size, hidden_size)).at[pad_value].set(0.0)
    posn_emb = init(next(keys), (max_window_size, hidden_size)).at[pad_value].set(0.0)

    wqkv_l, wo_l, w1_l, w2_l, bqkv_l, small_l, b1_l = ([] for _ in range(7))
    for _ in range(nlayers):
        # PyTorch-layout parameters (out_features, in_features)
        in_proj_w = init(next(keys), (3 * hidden_size, hidden_size))   # MHA in_proj_weight
        out_proj_w = init(next(keys), (hidden_size, hidden_size))      # MHA out_proj.weight
        lin1_w = init(next(keys), (dff, hidden_size))                  # linear1.weight
        lin2_w = init(next(keys), (hidden_size, dff))                  # linear2.weight

        # Static re-layout (done once, free): x @ wqkv = [q | k | v]; fold the 1/sqrt(d)
        # attention scale into the Wq columns (and the q bias — zero here) so the kernel
        # never multiplies by it.
        wqkv = in_proj_w.T                                             # (H, 3H)
        wqkv = wqkv.at[:, :hidden_size].multiply(scale)
        bqkv = jnp.zeros((1, 3 * hidden_size), jnp.float32)            # in_proj_bias (q scaled)

        wqkv_l.append(wqkv.astype(WEIGHT_DTYPE))
        wo_l.append(out_proj_w.T.astype(WEIGHT_DTYPE))                 # (H, H)
        w1_l.append(lin1_w.T.astype(WEIGHT_DTYPE))                     # (H, dff)
        w2_l.append(lin2_w.T.astype(WEIGHT_DTYPE))                     # (dff, H)
        bqkv_l.append(bqkv)
        # Packed small f32 params: rows [bo, ln1_w, ln1_b, b2, ln2_w, ln2_b, pad, pad].
        small_l.append(jnp.stack([
            jnp.zeros((hidden_size,), jnp.float32),    # out_proj bias
            jnp.ones((hidden_size,), jnp.float32),     # norm1 weight
            jnp.zeros((hidden_size,), jnp.float32),    # norm1 bias
            jnp.zeros((hidden_size,), jnp.float32),    # linear2 bias
            jnp.ones((hidden_size,), jnp.float32),     # norm2 weight
            jnp.zeros((hidden_size,), jnp.float32),    # norm2 bias
            jnp.zeros((hidden_size,), jnp.float32),    # pad (sublane alignment)
            jnp.zeros((hidden_size,), jnp.float32),    # pad
        ]))
        b1_l.append(jnp.zeros((1, dff), jnp.float32))  # linear1 bias

    layers = dict(wqkv=jnp.stack(wqkv_l), wo=jnp.stack(wo_l),
                  w1=jnp.stack(w1_l), w2=jnp.stack(w2_l),
                  bqkv=jnp.stack(bqkv_l), small=jnp.stack(small_l), b1=jnp.stack(b1_l))

    w_out_t = init(next(keys), (hidden_size, vocab_size)).astype(WEIGHT_DTYPE)  # W.T of nn.Linear
    b_out = jnp.zeros((1, vocab_size), jnp.float32)
    return dict(word_emb=word_emb, posn_emb=posn_emb, layers=layers,
                w_out_t=w_out_t, b_out=b_out)


def transformer_lm_forward(params, tokens, nheads, max_window_size, pad_value):
    """Equivalent of TransformerLM.forward in eval mode (dropout = 0)."""
    N, S = tokens.shape
    if S >= max_window_size:
        raise Exception("Maximum inference window size exceeded")
    H = params["word_emb"].shape[1]

    # Embedding gathers (glue: data-dependent row gather, done as plain JAX indexing).
    x = (params["word_emb"][tokens]
         + params["posn_emb"][jnp.arange(S)][None, :, :]).astype(jnp.float32)  # (N, S, H)

    # Layer-invariant per-batch additive attention bias (causal + key padding), computed once
    # here; the kernel DMAs it once per batch and never rebuilds it.
    pos = jnp.arange(S)
    causal = pos[:, None] >= pos[None, :]                                       # (S, S)
    keypad = tokens == pad_value                                                # (N, S)
    allowed = causal[None, :, :] & ~keypad[:, None, :]
    bias = jnp.where(allowed, 0.0, NEG_INF).astype(jnp.float32)                 # (N, S, S)

    hidden = transformer_encoder(x, bias, params["layers"], nheads)             # (N, S, H) f32
    # (Optionally the hidden could round-trip in bf16; kept f32 for closer parity.)
    logits = output_projection(hidden.reshape(N * S, H), params["w_out_t"], params["b_out"])
    return logits.reshape(N, S, -1)


# ----------------------------------------------------------------------------- main

if __name__ == "__main__":
    VOCAB = 256
    HIDDEN = 128
    NLAYERS = 2
    NHEADS = 4
    PAD_VALUE = 0
    MAX_WINDOW = 64
    DFF = 2048          # PyTorch TransformerEncoderLayer default dim_feedforward
    N, S = 2, 8

    key = jax.random.PRNGKey(0)
    pkey, tkey = jax.random.split(key)
    params = init_params(pkey, VOCAB, HIDDEN, NLAYERS, NHEADS, DFF, MAX_WINDOW, PAD_VALUE)
    # tokens in [1, VOCAB) so no fully-masked rows (PyTorch would NaN there too)
    tokens = jax.random.randint(tkey, (N, S), 1, VOCAB, dtype=jnp.int32)

    logits = transformer_lm_forward(params, tokens, NHEADS, MAX_WINDOW, PAD_VALUE)
    logits = jax.block_until_ready(logits)
    assert logits.shape == (N, S, VOCAB)
    assert bool(jnp.all(jnp.isfinite(logits)))
    print("KERNEL_OK")
</pallas_src>

<mosaic_0001>
module attributes {stable_mosaic.version = 11 : i64} {
  func.func @fused_encoder_kernel(%arg0: i32, %arg1: i32, %arg2: memref<1x8x128xf32, #tpu.memory_space<vmem>>, %arg3: memref<1x8x8xf32, #tpu.memory_space<vmem>>, %arg4: memref<1x128x384xbf16, #tpu.memory_space<vmem>>, %arg5: memref<1x128x128xbf16, #tpu.memory_space<vmem>>, %arg6: memref<1x128x2048xbf16, #tpu.memory_space<vmem>>, %arg7: memref<1x2048x128xbf16, #tpu.memory_space<vmem>>, %arg8: memref<1x1x384xf32, #tpu.memory_space<vmem>>, %arg9: memref<1x8x128xf32, #tpu.memory_space<vmem>>, %arg10: memref<1x1x2048xf32, #tpu.memory_space<vmem>>, %arg11: memref<1x8x128xf32, #tpu.memory_space<vmem>>, %arg12: memref<8x128xf32, #tpu.memory_space<vmem>>) attributes {dimension_semantics = [#tpu.dimension_semantics<parallel>, #tpu.dimension_semantics<arbitrary>], iteration_bounds = array<i64: 2, 2>, scalar_prefetch = 0 : i64, scratch_operands = 1 : i64, tpu.core_type = #tpu.core_type<tc>, window_params = [{transform_indices = @transform_0, window_bounds = array<i64: 1, 8, 128>}, {transform_indices = @transform_1, window_bounds = array<i64: 1, 8, 8>}, {transform_indices = @transform_2, window_bounds = array<i64: 1, 128, 384>}, {transform_indices = @transform_3, window_bounds = array<i64: 1, 128, 128>}, {transform_indices = @transform_4, window_bounds = array<i64: 1, 128, 2048>}, {transform_indices = @transform_5, window_bounds = array<i64: 1, 2048, 128>}, {transform_indices = @transform_6, window_bounds = array<i64: 1, 1, 384>}, {transform_indices = @transform_7, window_bounds = array<i64: 1, 8, 128>}, {transform_indices = @transform_8, window_bounds = array<i64: 1, 1, 2048>}, {transform_indices = @transform_9, window_bounds = array<i64: 1, 8, 128>}]} {
    %c0_i32 = arith.constant 0 : i32
    %0 = arith.cmpi eq, %arg1, %c0_i32 : i32
    %1 = arith.extui %0 : i1 to i32
    %c0_i32_0 = arith.constant 0 : i32
    %2 = arith.cmpi ne, %1, %c0_i32_0 : i32
    scf.if %2 {
      %c0_47 = arith.constant 0 : index
      %c0_48 = arith.constant 0 : index
      %c0_49 = arith.constant 0 : index
      %145 = vector.load %arg2[%c0_47, %c0_48, %c0_49] : memref<1x8x128xf32, #tpu.memory_space<vmem>>, vector<1x8x128xf32>
      %146 = vector.shape_cast %145 : vector<1x8x128xf32> to vector<8x128xf32>
      %c0_50 = arith.constant 0 : index
      %c0_51 = arith.constant 0 : index
      %147 = vector.load %arg12[%c0_50, %c0_51] : memref<8x128xf32, #tpu.memory_space<vmem>>, vector<8x128xf32>
      tpu.vector_store %arg12[%c0_50, %c0_51], %146 {strides = array<i32>} : memref<8x128xf32, #tpu.memory_space<vmem>>, vector<8x128xf32>,
    } else {
    }
    %c0 = arith.constant 0 : index
    %c0_1 = arith.constant 0 : index
    %3 = vector.load %arg12[%c0, %c0_1] : memref<8x128xf32, #tpu.memory_space<vmem>>, vector<8x128xf32>
    %c0_2 = arith.constant 0 : index
    %c0_3 = arith.constant 0 : index
    %c0_4 = arith.constant 0 : index
    %4 = vector.load %arg9[%c0_2, %c0_3, %c0_4] : memref<1x8x128xf32, #tpu.memory_space<vmem>>, vector<1x8x128xf32>
    %5 = vector.shape_cast %4 : vector<1x8x128xf32> to vector<8x128xf32>
    %6 = vector.extract_strided_slice %5 {offsets = [0, 0], sizes = [1, 128], strides = [1, 1]} : vector<8x128xf32> to vector<1x128xf32>
    %7 = vector.extract_strided_slice %5 {offsets = [1, 0], sizes = [1, 128], strides = [1, 1]} : vector<8x128xf32> to vector<1x128xf32>
    %8 = vector.extract_strided_slice %5 {offsets = [2, 0], sizes = [1, 128], strides = [1, 1]} : vector<8x128xf32> to vector<1x128xf32>
    %9 = vector.extract_strided_slice %5 {offsets = [3, 0], sizes = [1, 128], strides = [1, 1]} : vector<8x128xf32> to vector<1x128xf32>
    %10 = vector.extract_strided_slice %5 {offsets = [4, 0], sizes = [1, 128], strides = [1, 1]} : vector<8x128xf32> to vector<1x128xf32>
    %11 = vector.extract_strided_slice %5 {offsets = [5, 0], sizes = [1, 128], strides = [1, 1]} : vector<8x128xf32> to vector<1x128xf32>
    %12 = arith.truncf %3 : vector<8x128xf32> to vector<8x128xbf16>
    %c0_5 = arith.constant 0 : index
    %c0_6 = arith.constant 0 : index
    %c0_7 = arith.constant 0 : index
    %13 = vector.load %arg4[%c0_5, %c0_6, %c0_7] : memref<1x128x384xbf16, #tpu.memory_space<vmem>>, vector<1x128x384xbf16>
    %14 = vector.shape_cast %13 : vector<1x128x384xbf16> to vector<128x384xbf16>
    %cst = arith.constant dense<0.000000e+00> : vector<8x384xf32>
    %15 = tpu.matmul %12, %14, %cst {dimension_numbers = #tpu.dot_dimension_numbers<[1], [0], [0], [1], [0, 0, 1, 1], [], []>} : vector<8x128xbf16>, vector<128x384xbf16>, vector<8x384xf32> -> vector<8x384xf32>
    %c0_8 = arith.constant 0 : index
    %c0_9 = arith.constant 0 : index
    %c0_10 = arith.constant 0 : index
    %16 = vector.load %arg8[%c0_8, %c0_9, %c0_10] : memref<1x1x384xf32, #tpu.memory_space<vmem>>, vector<1x1x384xf32>
    %17 = vector.shape_cast %16 : vector<1x1x384xf32> to vector<1x384xf32>
    %18 = vector.broadcast %17 : vector<1x384xf32> to vector<8x384xf32>
    %19 = arith.addf %15, %18 : vector<8x384xf32>
    %20 = vector.extract_strided_slice %19 {offsets = [0, 0], sizes = [8, 32], strides = [1, 1]} : vector<8x384xf32> to vector<8x32xf32>
    %21 = vector.extract_strided_slice %19 {offsets = [0, 32], sizes = [8, 32], strides = [1, 1]} : vector<8x384xf32> to vector<8x32xf32>
    %22 = vector.extract_strided_slice %19 {offsets = [0, 64], sizes = [8, 32], strides = [1, 1]} : vector<8x384xf32> to vector<8x32xf32>
    %23 = vector.extract_strided_slice %19 {offsets = [0, 96], sizes = [8, 32], strides = [1, 1]} : vector<8x384xf32> to vector<8x32xf32>
    %24 = vector.shape_cast %20 : vector<8x32xf32> to vector<1x8x32xf32>
    %25 = vector.shape_cast %21 : vector<8x32xf32> to vector<1x8x32xf32>
    %26 = vector.shape_cast %22 : vector<8x32xf32> to vector<1x8x32xf32>
    %27 = vector.shape_cast %23 : vector<8x32xf32> to vector<1x8x32xf32>
    %28 = tpu.concatenate %24, %25, %26, %27 in 0 : vector<1x8x32xf32>, vector<1x8x32xf32>, vector<1x8x32xf32>, vector<1x8x32xf32> -> vector<4x8x32xf32>
    %29 = vector.extract_strided_slice %19 {offsets = [0, 128], sizes = [8, 32], strides = [1, 1]} : vector<8x384xf32> to vector<8x32xf32>
    %30 = vector.extract_strided_slice %19 {offsets = [0, 160], sizes = [8, 32], strides = [1, 1]} : vector<8x384xf32> to vector<8x32xf32>
    %31 = vector.extract_strided_slice %19 {offsets = [0, 192], sizes = [8, 32], strides = [1, 1]} : vector<8x384xf32> to vector<8x32xf32>
    %32 = vector.extract_strided_slice %19 {offsets = [0, 224], sizes = [8, 32], strides = [1, 1]} : vector<8x384xf32> to vector<8x32xf32>
    %33 = vector.shape_cast %29 : vector<8x32xf32> to vector<1x8x32xf32>
    %34 = vector.shape_cast %30 : vector<8x32xf32> to vector<1x8x32xf32>
    %35 = vector.shape_cast %31 : vector<8x32xf32> to vector<1x8x32xf32>
    %36 = vector.shape_cast %32 : vector<8x32xf32> to vector<1x8x32xf32>
    %37 = tpu.concatenate %33, %34, %35, %36 in 0 : vector<1x8x32xf32>, vector<1x8x32xf32>, vector<1x8x32xf32>, vector<1x8x32xf32> -> vector<4x8x32xf32>
    %38 = vector.extract_strided_slice %19 {offsets = [0, 256], sizes = [8, 32], strides = [1, 1]} : vector<8x384xf32> to vector<8x32xf32>
    %39 = vector.extract_strided_slice %19 {offsets = [0, 288], sizes = [8, 32], strides = [1, 1]} : vector<8x384xf32> to vector<8x32xf32>
    %40 = vector.extract_strided_slice %19 {offsets = [0, 320], sizes = [8, 32], strides = [1, 1]} : vector<8x384xf32> to vector<8x32xf32>
    %41 = vector.extract_strided_slice %19 {offsets = [0, 352], sizes = [8, 32], strides = [1, 1]} : vector<8x384xf32> to vector<8x32xf32>
    %42 = vector.shape_cast %38 : vector<8x32xf32> to vector<1x8x32xf32>
    %43 = vector.shape_cast %39 : vector<8x32xf32> to vector<1x8x32xf32>
    %44 = vector.shape_cast %40 : vector<8x32xf32> to vector<1x8x32xf32>
    %45 = vector.shape_cast %41 : vector<8x32xf32> to vector<1x8x32xf32>
    %46 = tpu.concatenate %42, %43, %44, %45 in 0 : vector<1x8x32xf32>, vector<1x8x32xf32>, vector<1x8x32xf32>, vector<1x8x32xf32> -> vector<4x8x32xf32>
    %47 = arith.truncf %28 : vector<4x8x32xf32> to vector<4x8x32xbf16>
    %48 = arith.truncf %37 : vector<4x8x32xf32> to vector<4x8x32xbf16>
    "tpu.trace_start"() <{level = 10 : i32, message = "nqd,nkd->nqk"}> : () -> ()
    %cst_11 = arith.constant dense<0.000000e+00> : vector<4x8x8xf32>
    %49 = tpu.matmul %47, %48, %cst_11 {dimension_numbers = #tpu.dot_dimension_numbers<[2], [2], [1], [1], [0, 0, 0, 1, 1, 1], [0], [0]>} : vector<4x8x32xbf16>, vector<4x8x32xbf16>, vector<4x8x8xf32> -> vector<4x8x8xf32>
    "tpu.trace_stop"() : () -> ()
    %c0_12 = arith.constant 0 : index
    %c0_13 = arith.constant 0 : index
    %c0_14 = arith.constant 0 : index
    %50 = vector.load %arg3[%c0_12, %c0_13, %c0_14] : memref<1x8x8xf32, #tpu.memory_space<vmem>>, vector<1x8x8xf32>
    %51 = vector.shape_cast %50 : vector<1x8x8xf32> to vector<8x8xf32>
    %52 = vector.shape_cast %51 : vector<8x8xf32> to vector<1x8x8xf32>
    %53 = vector.broadcast %52 : vector<1x8x8xf32> to vector<4x8x8xf32>
    %54 = arith.addf %49, %53 : vector<4x8x8xf32>
    %cst_15 = arith.constant dense<0xFF800000> : vector<4x8xf32>
    %55 = vector.multi_reduction <maximumf>, %54, %cst_15 [2] : vector<4x8x8xf32> to vector<4x8xf32>
    %56 = vector.shape_cast %55 : vector<4x8xf32> to vector<4x8x1xf32>
    %57 = vector.broadcast %56 : vector<4x8x1xf32> to vector<4x8x8xf32>
    %58 = arith.subf %54, %57 : vector<4x8x8xf32>
    %59 = math.exp %58 : vector<4x8x8xf32>
    %cst_16 = arith.constant dense<0.000000e+00> : vector<4x8xf32>
    %60 = vector.multi_reduction <add>, %59, %cst_16 [2] : vector<4x8x8xf32> to vector<4x8xf32>
    %61 = vector.shape_cast %60 : vector<4x8xf32> to vector<4x8x1xf32>
    %62 = tpu.reciprocal %61 {approx = true} : vector<4x8x1xf32> -> vector<4x8x1xf32>
    %63 = vector.broadcast %62 : vector<4x8x1xf32> to vector<4x8x8xf32>
    %64 = arith.mulf %59, %63 : vector<4x8x8xf32>
    %65 = arith.truncf %64 : vector<4x8x8xf32> to vector<4x8x8xbf16>
    %66 = arith.truncf %46 : vector<4x8x32xf32> to vector<4x8x32xbf16>
    "tpu.trace_start"() <{level = 10 : i32, message = "nqk,nkd->nqd"}> : () -> ()
    %cst_17 = arith.constant dense<0.000000e+00> : vector<4x8x32xf32>
    %67 = tpu.matmul %65, %66, %cst_17 {dimension_numbers = #tpu.dot_dimension_numbers<[2], [1], [1], [2], [0, 0, 0, 1, 1, 2], [0], [0]>} : vector<4x8x8xbf16>, vector<4x8x32xbf16>, vector<4x8x32xf32> -> vector<4x8x32xf32>
    "tpu.trace_stop"() : () -> ()
    %68 = vector.extract_strided_slice %67 {offsets = [0, 0, 0], sizes = [1, 8, 32], strides = [1, 1, 1]} : vector<4x8x32xf32> to vector<1x8x32xf32>
    %69 = vector.shape_cast %68 : vector<1x8x32xf32> to vector<8x32xf32>
    %70 = vector.extract_strided_slice %67 {offsets = [1, 0, 0], sizes = [1, 8, 32], strides = [1, 1, 1]} : vector<4x8x32xf32> to vector<1x8x32xf32>
    %71 = vector.shape_cast %70 : vector<1x8x32xf32> to vector<8x32xf32>
    %72 = vector.extract_strided_slice %67 {offsets = [2, 0, 0], sizes = [1, 8, 32], strides = [1, 1, 1]} : vector<4x8x32xf32> to vector<1x8x32xf32>
    %73 = vector.shape_cast %72 : vector<1x8x32xf32> to vector<8x32xf32>
    %74 = vector.extract_strided_slice %67 {offsets = [3, 0, 0], sizes = [1, 8, 32], strides = [1, 1, 1]} : vector<4x8x32xf32> to vector<1x8x32xf32>
    %75 = vector.shape_cast %74 : vector<1x8x32xf32> to vector<8x32xf32>
    %76 = tpu.concatenate %69, %71, %73, %75 in 1 : vector<8x32xf32>, vector<8x32xf32>, vector<8x32xf32>, vector<8x32xf32> -> vector<8x128xf32>
    %77 = arith.truncf %76 : vector<8x128xf32> to vector<8x128xbf16>
    %c0_18 = arith.constant 0 : index
    %c0_19 = arith.constant 0 : index
    %c0_20 = arith.constant 0 : index
    %78 = vector.load %arg5[%c0_18, %c0_19, %c0_20] : memref<1x128x128xbf16, #tpu.memory_space<vmem>>, vector<1x128x128xbf16>
    %79 = vector.shape_cast %78 : vector<1x128x128xbf16> to vector<128x128xbf16>
    %cst_21 = arith.constant dense<0.000000e+00> : vector<8x128xf32>
    %80 = tpu.matmul %77, %79, %cst_21 {dimension_numbers = #tpu.dot_dimension_numbers<[1], [0], [0], [1], [0, 0, 1, 1], [], []>} : vector<8x128xbf16>, vector<128x128xbf16>, vector<8x128xf32> -> vector<8x128xf32>
    %81 = vector.broadcast %6 : vector<1x128xf32> to vector<8x128xf32>
    %82 = arith.addf %80, %81 : vector<8x128xf32>
    %83 = arith.addf %3, %82 : vector<8x128xf32>
    %cst_22 = arith.constant dense<0.000000e+00> : vector<8xf32>
    %84 = vector.multi_reduction <add>, %83, %cst_22 [1] : vector<8x128xf32> to vector<8xf32>
    %85 = vector.shape_cast %84 : vector<8xf32> to vector<8x1xf32>
    %cst_23 = arith.constant 1.280000e+02 : f32
    %86 = vector.broadcast %cst_23 : f32 to vector<8x1xf32>
    %87 = arith.divf %85, %86 : vector<8x1xf32>
    %88 = vector.broadcast %87 : vector<8x1xf32> to vector<8x128xf32>
    %89 = arith.subf %83, %88 : vector<8x128xf32>
    %90 = arith.mulf %89, %89 : vector<8x128xf32>
    %cst_24 = arith.constant dense<0.000000e+00> : vector<8xf32>
    %91 = vector.multi_reduction <add>, %90, %cst_24 [1] : vector<8x128xf32> to vector<8xf32>
    %92 = vector.shape_cast %91 : vector<8xf32> to vector<8x1xf32>
    %cst_25 = arith.constant 1.280000e+02 : f32
    %93 = vector.broadcast %cst_25 : f32 to vector<8x1xf32>
    %94 = arith.divf %92, %93 : vector<8x1xf32>
    %cst_26 = arith.constant 9.99999974E-6 : f32
    %95 = vector.broadcast %cst_26 : f32 to vector<8x1xf32>
    %96 = arith.addf %94, %95 : vector<8x1xf32>
    %97 = math.rsqrt %96 : vector<8x1xf32>
    %98 = vector.broadcast %97 : vector<8x1xf32> to vector<8x128xf32>
    %99 = arith.mulf %89, %98 : vector<8x128xf32>
    %100 = vector.broadcast %7 : vector<1x128xf32> to vector<8x128xf32>
    %101 = arith.mulf %99, %100 : vector<8x128xf32>
    %102 = vector.broadcast %8 : vector<1x128xf32> to vector<8x128xf32>
    %103 = arith.addf %101, %102 : vector<8x128xf32>
    %104 = arith.truncf %103 : vector<8x128xf32> to vector<8x128xbf16>
    %c0_27 = arith.constant 0 : index
    %c0_28 = arith.constant 0 : index
    %c0_29 = arith.constant 0 : index
    %105 = vector.load %arg6[%c0_27, %c0_28, %c0_29] : memref<1x128x2048xbf16, #tpu.memory_space<vmem>>, vector<1x128x2048xbf16>
    %106 = vector.shape_cast %105 : vector<1x128x2048xbf16> to vector<128x2048xbf16>
    %cst_30 = arith.constant dense<0.000000e+00> : vector<8x2048xf32>
    %107 = tpu.matmul %104, %106, %cst_30 {dimension_numbers = #tpu.dot_dimension_numbers<[1], [0], [0], [1], [0, 0, 1, 1], [], []>} : vector<8x128xbf16>, vector<128x2048xbf16>, vector<8x2048xf32> -> vector<8x2048xf32>
    %c0_31 = arith.constant 0 : index
    %c0_32 = arith.constant 0 : index
    %c0_33 = arith.constant 0 : index
    %108 = vector.load %arg10[%c0_31, %c0_32, %c0_33] : memref<1x1x2048xf32, #tpu.memory_space<vmem>>, vector<1x1x2048xf32>
    %109 = vector.shape_cast %108 : vector<1x1x2048xf32> to vector<1x2048xf32>
    %110 = vector.broadcast %109 : vector<1x2048xf32> to vector<8x2048xf32>
    %111 = arith.addf %107, %110 : vector<8x2048xf32>
    %cst_34 = arith.constant 0.000000e+00 : f32
    %112 = vector.broadcast %cst_34 : f32 to vector<8x2048xf32>
    %113 = arith.maximumf %111, %112 : vector<8x2048xf32>
    %114 = arith.truncf %113 : vector<8x2048xf32> to vector<8x2048xbf16>
    %c0_35 = arith.constant 0 : index
    %c0_36 = arith.constant 0 : index
    %c0_37 = arith.constant 0 : index
    %115 = vector.load %arg7[%c0_35, %c0_36, %c0_37] : memref<1x2048x128xbf16, #tpu.memory_space<vmem>>, vector<1x2048x128xbf16>
    %116 = vector.shape_cast %115 : vector<1x2048x128xbf16> to vector<2048x128xbf16>
    %cst_38 = arith.constant dense<0.000000e+00> : vector<8x128xf32>
    %117 = tpu.matmul %114, %116, %cst_38 {dimension_numbers = #tpu.dot_dimension_numbers<[1], [0], [0], [1], [0, 0, 1, 1], [], []>} : vector<8x2048xbf16>, vector<2048x128xbf16>, vector<8x128xf32> -> vector<8x128xf32>
    %118 = vector.broadcast %9 : vector<1x128xf32> to vector<8x128xf32>
    %119 = arith.addf %117, %118 : vector<8x128xf32>
    %120 = arith.addf %103, %119 : vector<8x128xf32>
    %cst_39 = arith.constant dense<0.000000e+00> : vector<8xf32>
    %121 = vector.multi_reduction <add>, %120, %cst_39 [1] : vector<8x128xf32> to vector<8xf32>
    %122 = vector.shape_cast %121 : vector<8xf32> to vector<8x1xf32>
    %cst_40 = arith.constant 1.280000e+02 : f32
    %123 = vector.broadcast %cst_40 : f32 to vector<8x1xf32>
    %124 = arith.divf %122, %123 : vector<8x1xf32>
    %125 = vector.broadcast %124 : vector<8x1xf32> to vector<8x128xf32>
    %126 = arith.subf %120, %125 : vector<8x128xf32>
    %127 = arith.mulf %126, %126 : vector<8x128xf32>
    %cst_41 = arith.constant dense<0.000000e+00> : vector<8xf32>
    %128 = vector.multi_reduction <add>, %127, %cst_41 [1] : vector<8x128xf32> to vector<8xf32>
    %129 = vector.shape_cast %128 : vector<8xf32> to vector<8x1xf32>
    %cst_42 = arith.constant 1.280000e+02 : f32
    %130 = vector.broadcast %cst_42 : f32 to vector<8x1xf32>
    %131 = arith.divf %129, %130 : vector<8x1xf32>
    %cst_43 = arith.constant 9.99999974E-6 : f32
    %132 = vector.broadcast %cst_43 : f32 to vector<8x1xf32>
    %133 = arith.addf %131, %132 : vector<8x1xf32>
    %134 = math.rsqrt %133 : vector<8x1xf32>
    %135 = vector.broadcast %134 : vector<8x1xf32> to vector<8x128xf32>
    %136 = arith.mulf %126, %135 : vector<8x128xf32>
    %137 = vector.broadcast %10 : vector<1x128xf32> to vector<8x128xf32>
    %138 = arith.mulf %136, %137 : vector<8x128xf32>
    %139 = vector.broadcast %11 : vector<1x128xf32> to vector<8x128xf32>
    %140 = arith.addf %138, %139 : vector<8x128xf32>
    %c0_44 = arith.constant 0 : index
    %c0_45 = arith.constant 0 : index
    %141 = vector.load %arg12[%c0_44, %c0_45] : memref<8x128xf32, #tpu.memory_space<vmem>>, vector<8x128xf32>
    tpu.vector_store %arg12[%c0_44, %c0_45], %140 {strides = array<i32>} : memref<8x128xf32, #tpu.memory_space<vmem>>, vector<8x128xf32>,
    %c1_i32 = arith.constant 1 : i32
    %142 = arith.cmpi eq, %arg1, %c1_i32 : i32
    %143 = arith.extui %142 : i1 to i32
    %c0_i32_46 = arith.constant 0 : i32
    %144 = arith.cmpi ne, %143, %c0_i32_46 : i32
    scf.if %144 {
      %c0_47 = arith.constant 0 : index
      %c0_48 = arith.constant 0 : index
      %c0_49 = arith.constant 0 : index
      %145 = vector.load %arg11[%c0_47, %c0_48, %c0_49] : memref<1x8x128xf32, #tpu.memory_space<vmem>>, vector<1x8x128xf32>
      %146 = vector.shape_cast %145 : vector<1x8x128xf32> to vector<8x128xf32>
      %147 = vector.shape_cast %140 : vector<8x128xf32> to vector<1x8x128xf32>
      tpu.vector_store %arg11[%c0_47, %c0_48, %c0_49], %147 {strides = array<i32>} : memref<1x8x128xf32, #tpu.memory_space<vmem>>, vector<1x8x128xf32>,
    } else {
    }
    return
  }
  func.func @transform_0(%arg0: i32, %arg1: i32) -> (i32, i32, i32) {
    %c0_i32 = arith.constant 0 : i32
    %c0_i32_0 = arith.constant 0 : i32
    %c0_i32_1 = arith.constant 0 : i32
    return %arg0, %c0_i32, %c0_i32_0 : i32, i32, i32
  }
  func.func @transform_1(%arg0: i32, %arg1: i32) -> (i32, i32, i32) {
    %c0_i32 = arith.constant 0 : i32
    %c0_i32_0 = arith.constant 0 : i32
    %c0_i32_1 = arith.constant 0 : i32
    return %arg0, %c0_i32, %c0_i32_0 : i32, i32, i32
  }
  func.func @transform_2(%arg0: i32, %arg1: i32) -> (i32, i32, i32) {
    %c0_i32 = arith.constant 0 : i32
    %c0_i32_0 = arith.constant 0 : i32
    %c0_i32_1 = arith.constant 0 : i32
    return %arg1, %c0_i32, %c0_i32_0 : i32, i32, i32
  }
  func.func @transform_3(%arg0: i32, %arg1: i32) -> (i32, i32, i32) {
    %c0_i32 = arith.constant 0 : i32
    %c0_i32_0 = arith.constant 0 : i32
    %c0_i32_1 = arith.constant 0 : i32
    return %arg1, %c0_i32, %c0_i32_0 : i32, i32, i32
  }
  func.func @transform_4(%arg0: i32, %arg1: i32) -> (i32, i32, i32) {
    %c0_i32 = arith.constant 0 : i32
    %c0_i32_0 = arith.constant 0 : i32
    %c0_i32_1 = arith.constant 0 : i32
    return %arg1, %c0_i32, %c0_i32_0 : i32, i32, i32
  }
  func.func @transform_5(%arg0: i32, %arg1: i32) -> (i32, i32, i32) {
    %c0_i32 = arith.constant 0 : i32
    %c0_i32_0 = arith.constant 0 : i32
    %c0_i32_1 = arith.constant 0 : i32
    return %arg1, %c0_i32, %c0_i32_0 : i32, i32, i32
  }
  func.func @transform_6(%arg0: i32, %arg1: i32) -> (i32, i32, i32) {
    %c0_i32 = arith.constant 0 : i32
    %c0_i32_0 = arith.constant 0 : i32
    %c0_i32_1 = arith.constant 0 : i32
    return %arg1, %c0_i32, %c0_i32_0 : i32, i32, i32
  }
  func.func @transform_7(%arg0: i32, %arg1: i32) -> (i32, i32, i32) {
    %c0_i32 = arith.constant 0 : i32
    %c0_i32_0 = arith.constant 0 : i32
    %c0_i32_1 = arith.constant 0 : i32
    return %arg1, %c0_i32, %c0_i32_0 : i32, i32, i32
  }
  func.func @transform_8(%arg0: i32, %arg1: i32) -> (i32, i32, i32) {
    %c0_i32 = arith.constant 0 : i32
    %c0_i32_0 = arith.constant 0 : i32
    %c0_i32_1 = arith.constant 0 : i32
    return %arg1, %c0_i32, %c0_i32_0 : i32, i32, i32
  }
  func.func @transform_9(%arg0: i32, %arg1: i32) -> (i32, i32, i32) {
    %c0_i32 = arith.constant 0 : i32
    %c0_i32_0 = arith.constant 0 : i32
    %c0_i32_1 = arith.constant 0 : i32
    return %arg0, %c0_i32, %c0_i32_0 : i32, i32, i32
  }
}

</mosaic_0001>

<bundles_post_ra>
// kernel: tpu_custom_call.1
= control target key start
LH: loop header
LB: loop body
LE: loop exit
PB: predicated region body
PF: predicated region fallthrough
CT: control target
= control target key end

     0   :  { %s6758_s0 = inlined_call_operand.hbm [shape: f32[2,8,128], index: 0, kind: input, shape index: {}]   ;;  %s6759_s1 = inlined_call_operand.hbm [shape: f32[2,8,8], index: 1, kind: input, shape index: {}]   ;;  %s6760_s2 = inlined_call_operand.hbm [shape: bf16[2,128,384], index: 2, kind: input, shape index: {}]   ;;  %s6761_s3 = inlined_call_operand.hbm [shape: bf16[2,128,128], index: 3, kind: input, shape index: {}]   ;;  %s6762_s4 = inlined_call_operand.hbm [shape: bf16[2,128,2048], index: 4, kind: input, shape index: {}]   ;;  %s6763_s5 = inlined_call_operand.hbm [shape: bf16[2,2048,128], index: 5, kind: input, shape index: {}]   ;;  %s6764_s6 = inlined_call_operand.vmem [shape: f32[2,1,384], index: 6, kind: input, shape index: {}]   ;;  %s6765_s7 = inlined_call_operand.vmem [shape: f32[2,8,128], index: 7, kind: input, shape index: {}]   ;;  %s6766_s8 = inlined_call_operand.hbm [shape: f32[2,1,2048], index: 8, kind: input, shape index: {}]   ;;  %s6767_s9 = inlined_call_operand.hbm [shape: f32[2,8,128], index: 9, kind: output, shape index: {}]  }
   0x1   :  { %6801 = sst [smem:[#allocation39_spill]] %s6759_s1 }
   0x2   :  { %6802 = sst [smem:[#allocation40_spill]] %s6761_s3 }
   0x3   :  { %6803 = sst [smem:[#allocation41_spill]] %s6763_s5 }
   0x4   :  { %6804 = sst [smem:[#allocation42_spill]] %s6764_s6 }
   0x5   :  { %6805 = sst [smem:[#allocation43_spill]] %s6765_s7 }
   0x6   :  { %6806 = sst [smem:[#allocation44_spill]] %s6767_s9 }
   0x7   :  { %14 = vsyncpa [#allocation4], 0 }
   0x8   :  { %16 = vsyncpa [#allocation4 + $0x1], 0 }
   0x9   :  { %17 = vsyncpa [#allocation7], 0 }
   0xa   :  { %19 = vsyncpa [#allocation7 + $0x1], 0 }
   0xb   :  { %20 = vsyncpa [#allocation10], 0 }
   0xc   :  { %22 = vsyncpa [#allocation10 + $0x1], 0 }
   0xd   :  { %23 = vsyncpa [#allocation13], 0 }
   0xe   :  { %25 = vsyncpa [#allocation13 + $0x1], 0 }
   0xf   :  { %26 = vsyncpa [#allocation5], 0 }
  0x10   :  { %28 = vsyncpa [#allocation5 + $0x1], 0  ;;  %s5726_s30 = smov 0   ;;  %s5728_s10 = smov 0  }
  0x11   :  { %s5730_s11 = smov 0   ;;  %s5732_s12 = smov 0  }
  0x12   :  { %s5734_s13 = smov 0   ;;  %s5736_s14 = smov 0  }
  0x13   :  { %s5738_s15 = smov 0   ;;  %s5740_s16 = smov 0  }
  0x14   :  { %s5742_s17 = smov 0   ;;  %s5744_s18 = smov 0  }
  0x15   :  { %s5746_s19 = smov 0  }
  0x16 LB: > { %6807 = sst [smem:[#allocation22_spill]] %s5619_s10  ;;  %s5782_s20 = sadd.s32 4294967295, %s5655_s19   ;;  %s5655_s19 = sphi %s5746_s19, %s34_s19   ;;  %s5651_s18 = sphi %s5744_s18, %s6883_s18   ;;  %s5647_s17 = sphi %s5742_s17, %s6882_s17   ;;  %s5643_s16 = sphi %s5740_s16, %s6881_s16   ;;  %s5639_s15 = sphi %s5738_s15, %s6880_s15   ;;  %s5635_s14 = sphi %s5736_s14, %s6879_s14   ;;  %s5631_s13 = sphi %s5734_s13, %s6878_s13   ;;  %s5627_s12 = sphi %s5732_s12, %s6874_s12   ;;  %s5623_s11 = sphi %s5730_s11, %s6873_s11   ;;  %s5619_s10 = sphi %s5728_s10, %s6872_s10   ;;  %s5615_s30 = sphi %s5726_s30, %s6871_s30  }
  0x17   : > { %6808 = sst [smem:[#allocation23_spill]] %s5623_s11  ;;  %s4337_s21 = sadd.s32 4294967294, %s5655_s19  }
  0x18   : > { %6809 = sst [smem:[#allocation24_spill]] %s5627_s12  ;;  %s43_s22 = sadd.s32 1, %s5647_s17 }
  0x19   : > { %6810 = sst [smem:[#allocation25_spill]] %s5631_s13  ;;  %s46_s23 = sadd.s32 1, %s5651_s18 }
  0x1a   : > { %6811 = sst [smem:[#allocation26_spill]] %s5639_s15  ;;  %p44_p0 = scmp.ge.s32.totalorder %s43_s22, 2 }
  0x1b   : > { %6812 = sst [smem:[#allocation27_spill]] %s5643_s16  ;;  %s53_s24 = sadd.s32 1, %s5635_s14 }
  0x1c   : > { %6813 = sst [smem:[#allocation28_spill]] %s5655_s19  ;;  %p60_p1 = scmp.ne.s32.totalorder %s5635_s14, %s5631_s13 }
  0x1d   : > { %6814 = sst [smem:[#allocation29_spill]] %s5782_s20  ;;  %p61_p2 = scmp.eq.s32.totalorder %s5655_s19, 0 }
  0x1e   : > { %s6885_s22 = smov (%p44_p0, %s43_s22), 0  ;;  %s6887_s23 = smov (!%p44_p0, %s46_s23), %s5651_s18 }
  0x1f   : > { %6815 = sst [smem:[#allocation30_spill]] %s6885_s22  ;;  %p5799_p3 = por %p61_p2, %p60_p1 }
  0x20   : > { %p6770_p4 = scmp.ne.s32.totalorder %s5631_s13, %s5627_s12  ;;  %p48_p5 = scmp.ge.s32.totalorder %s6887_s23, 2 }
  0x21   : > { %p67_p6 = scmp.eq.s32.totalorder %s5782_s20, 0  ;;  %s102_s26 = ssub.s32 %s5647_s17, %s6885_s22 }
  0x22   : > { %s105_s27 = sadd.s32 1, %s5623_s11  ;;  %s6889_s23 = smov (%p48_p5, %s6887_s23), 0 }
  0x23   : > { %6817 = sst [smem:[#allocation31_spill]] %s6889_s23  ;;  %p5816_p7 = por %p67_p6, %p6770_p4 }
  0x24   : > { %p103_p8 = scmp.eq.s32.totalorder %s102_s26, 0  ;;  %s50_s29 = ssub.s32 %s5651_s18, %s6889_s23 }
  0x25   : > { %s6818_s28 = scalar_select %p5816_p7, 1, 0 }
  0x26   : > { %p112_p9 = scmp.ne.s32.totalorder %s5623_s11, %s5619_s10  ;;  %p51_p10 = scmp.eq.s32.totalorder %s50_s29, 0 }
  0x27   : > { %6819 = sst [smem:[#allocation32_spill]] %s6818_s28  ;;  %p118_p11 = scmp.ne.s32.totalorder %s5619_s10, %s5615_s30 }
  0x28   : > { %s5827_s22 = scalar_select %p103_p8, %s5623_s11, %s105_s27  }
  0x29   : > { %s5830_s9 = scalar_select %p51_p10, %s5635_s14, %s53_s24  }
  0x2a   : > { %6820 = sst [smem:[#allocation33_spill]] %s5827_s22  ;;  %p5834_p12 = por %p112_p9, %p61_p2 }
  0x2b   : > { %6821 = sst [smem:[#allocation34_spill]] %s5830_s9  ;;  %p5840_p13 = por %p118_p11, %p67_p6 }
  0x2c   : > { %p298_p0 = scmp.eq.s32.totalorder %s5782_s20, 3  ;;  %p304_p5 = scmp.eq.s32.totalorder %s4337_s21, 3 }
  0x2d   : > { %s6823_s26 = scalar_select %p5840_p13, 1, 0 }
  0x2e   : > { %p5016_p4 = scmp.lt.s32.totalorder %s5655_s19, 4  ;;  %p5849_p7 = por %p298_p0, %p60_p1 }
  0x2f   : > { %6824 = sst [smem:[#allocation35_spill]] %s6823_s26  ;;  %p6827_p8 = scmp.ne.s32.totalorder %s5631_s13, %s5627_s12 }
  0x30   : > { %s6825_s30 = scalar_select %p5849_p7, 1, 0 }
  0x31   : > { %p5856_p10 = por %p304_p5, %p6827_p8  ;;  %s6775_s27 = sand.u32 1, %s5635_s14  }
  0x32   : > { %6826 = sst [smem:[#allocation36_spill]] %s6825_s30  ;;  %s6778_s29 = sshll.u32 %s5651_s18, 7 }
  0x33   : > { %s6828_s24 = scalar_select %p5856_p10, 1, 0 }
  0x34   : > { %s5864_s23 = sshll.u32 %s6775_s27, 3  ;;  %p5868_p2 = pnand %p5016_p4, %p5799_p3 }
  0x35   : > { %6829 = sst [smem:[#allocation37_spill]] %s6828_s24  ;;  %s5873_s9 = sand.u32 1, %s5655_s19  }
  0x36   : > { %s6830_s21 = scalar_select %p5868_p2, 1, 0 }
  0x37   : > { %s6831_s1 = sld [smem:[#allocation39_spill]]  ;;  %s346_s25 = scalar_lea.vmem [#allocation6], %s5864_s23 }
  0x38   : > { %s353_s27 = sshll.u32 %s346_s25, 4  ;;  %p5887_p1 = pnand %p5016_p4, %p5834_p12  ;;  %s5883_s27 = int_to_ptr.vmem [resolvable:$true] %s353_s27 }
  0x39   : > { %s6782_s6 = scalar_lea.sflag [#allocation7], %s5873_s9  ;;  %p6786_p6 = pneg %p5868_p2 }
  0x3a   : > { %s6832_s30 = scalar_select %p5887_p1, 1, 0 }
  0x3d   : > { %s5880_s24 = scalar_lea.hbm %s6831_s1, %s6778_s29  ;;  %s5312_s25 = scalar_lea.hbm %s6831_s1, 256 }
  0x3e   : > { %s5307_s7 = scalar_lea.hbm %s5880_s24, 128  ;;  %p5313_p4 = scmp.lt.u32.totalorder %s5880_s24, %s6831_s1 }
  0x3f   : > { %p5308_p3 = scmp.ne.s32.totalorder %s5880_s24, %s5307_s7  ;;  %p5314_p12 = scmp.lt.u32.totalorder %s5312_s25, %s5307_s7 }
  0x40   : > { %p5316_p5 = scmp.lt.u32.totalorder %s5307_s7, %s5880_s24 }
  0x41   : > { %p5310_p9 = pnand %p6786_p6, %p5308_p3  ;;  %p5315_p0 = por %p5314_p12, %p5313_p4 }
  0x43   : > { %p5311_p11 = pneg %p5310_p9  ;;  %p5317_p8 = por %p5316_p5, %p5315_p0 }
  0x45   : > { %p5318_p10 = pnand %p5317_p8, %p5311_p11 }
  0x47   : > { %5321 = shalt.err (!%p5318_p10)
}
  0x48   : > { %s5322_s16 = scalar_lea.vmem %s5883_s27, 128  ;;  %s5657_s12 = smov [#allocation6]  }
  0x49   : > { %p5323_p3 = scmp.ne.s32.totalorder %s5883_s27, %s5322_s16  ;;  %s5327_s22 = sshll.u32 %s5657_s12, 4  ;;  %s5328_s22 = int_to_ptr.vmem [resolvable:$false] %s5327_s22 }
  0x4a   : > { %s5329_s15 = scalar_lea.vmem %s5328_s22, 256  ;;  %p5330_p13 = scmp.lt.s32.totalorder %s5883_s27, %s5328_s22 }
  0x4b   : > { %p5325_p9 = pnand %p5323_p3, %p6786_p6  ;;  %p5331_p4 = scmp.lt.s32.totalorder %s5329_s15, %s5322_s16 }
  0x4d   : > { %p5326_p7 = pneg %p5325_p9  ;;  %p5332_p12 = por %p5331_p4, %p5330_p13 }
  0x4f   : > { %p5333_p0 = pnand %p5332_p12, %p5326_p7 }
  0x51   : > { %5336 = shalt.err (!%p5333_p0)
}
  0x52   : > { %4996 = dma.hbm_to_vmem [thread:$0]  (!%p5868_p2), %s5880_s24, 128, %s5883_s27, %s6782_s6  }
  0x53   : > { %p4357_p10 = scmp.ge.s32.totalorder %s5655_s19, 1  ;;  %p475_p11 = scmp.lt.s32.totalorder %s5655_s19, 5 }
  0x54   : > { %s5922_s7 = sand.u32 1, %s5623_s11   ;;  %s4668_s25 = sshll.u32 %s5647_s17, 10 }
  0x55   : > { %s4345_s29 = sshll.u32 %s5922_s7, 6  ;;  %p5926_p7 = pnand %p4357_p10, %p475_p11 }
  0x56   : > { %s6835_s3 = sld [smem:[#allocation40_spill]]  ;;  %s385_s24 = scalar_lea.vmem [#allocation9], %s4345_s29 }
  0x57   : > { %s6833_s16 = scalar_select %p5926_p7, 1, 0 }
  0x58   : > { %s392_s27 = sshll.u32 %s385_s24, 4  ;;  %s6796_s1 = scalar_lea.sflag [#allocation10], %s5873_s9  ;;  %s5935_s27 = int_to_ptr.vmem [resolvable:$true] %s392_s27 }
  0x59   : > { %6834 = sst [smem:[#allocation38_spill]] %s6833_s16  ;;  %p5943_p5 = pneg %p5887_p1 }
  0x5c   : > { %s5933_s15 = scalar_lea.hbm %s6835_s3, %s4668_s25  ;;  %s5342_s29 = scalar_lea.hbm %s6835_s3, 2048 }
  0x5d   : > { %s5337_s11 = scalar_lea.hbm %s5933_s15, 1024  ;;  %p5343_p9 = scmp.lt.u32.totalorder %s5933_s15, %s6835_s3 }
  0x5e   : > { %p5338_p13 = scmp.ne.s32.totalorder %s5933_s15, %s5337_s11  ;;  %p5344_p4 = scmp.lt.u32.totalorder %s5342_s29, %s5337_s11 }
  0x5f   : > { %p5346_p0 = scmp.lt.u32.totalorder %s5337_s11, %s5933_s15 }
  0x60   : > { %p5340_p8 = pnand %p5943_p5, %p5338_p13  ;;  %p5345_p12 = por %p5344_p4, %p5343_p9 }
  0x62   : > { %p5341_p3 = pneg %p5340_p8  ;;  %p5347_p10 = por %p5346_p0, %p5345_p12 }
  0x64   : > { %p5348_p11 = pnand %p5347_p10, %p5341_p3 }
  0x66   : > { %5351 = shalt.err (!%p5348_p11)
}
  0x67   : > { %s5352_s6 = scalar_lea.vmem %s5935_s27, 1024  ;;  %s5658_s25 = smov [#allocation9]  }
  0x68   : > { %p5353_p13 = scmp.ne.s32.totalorder %s5935_s27, %s5352_s6  ;;  %s5357_s12 = sshll.u32 %s5658_s25, 4  ;;  %s5358_s12 = int_to_ptr.vmem [resolvable:$false] %s5357_s12 }
  0x69   : > { %s5359_s22 = scalar_lea.vmem %s5358_s12, 2048  ;;  %p5360_p7 = scmp.lt.s32.totalorder %s5935_s27, %s5358_s12 }
  0x6a   : > { %p5355_p8 = pnand %p5353_p13, %p5943_p5  ;;  %p5361_p2 = scmp.lt.s32.totalorder %s5359_s22, %s5352_s6 }
  0x6c   : > { %p5356_p6 = pneg %p5355_p8  ;;  %p5362_p9 = por %p5361_p2, %p5360_p7 }
  0x6e   : > { %p5363_p4 = pnand %p5362_p9, %p5356_p6 }
  0x70   : > { %5366 = shalt.err (!%p5363_p4)
}
  0x71   : > { %s5659_s11 = smov 64   ;;  %s5660_s29 = smov 4  }
  0x72   : > { %5002 = dma.hbm_to_vmem [thread:$0]  (!%p5887_p1), %s5933_s15, 1024, %s5935_s27, %s6796_s1, %s5659_s11, %s5659_s11, %s5660_s29  }
  0x73   : > { %s4669_s6 = sshll.u32 %s5647_s17, 14  ;;  %s6837_s22 = sshll.u32 %s5922_s7, 10 }
  0x74   : > { %s5975_s12 = scalar_lea.hbm %s6762_s4, %s4669_s6  ;;  %s406_s3 = scalar_lea.vmem [#allocation11], %s6837_s22 }
  0x75   : > { %s413_s26 = sshll.u32 %s406_s3, 4  ;;  %s6838_s5 = sld [smem:[#allocation41_spill]]  ;;  %s5979_s26 = int_to_ptr.vmem [resolvable:$true] %s413_s26 }
  0x76   : > { %s6839_s13 = smov %s6837_s22  ;;  %s424_s24 = scalar_lea.sflag [#allocation13], %s5873_s9 }
  0x77   : > { %s427_s15 = scalar_lea.vmem [#allocation12], %s6839_s13 }
  0x78   : > { %s434_s27 = sshll.u32 %s427_s15, 4  ;;  %s5988_s27 = int_to_ptr.vmem [resolvable:$true] %s434_s27 }
  0x7b   : > { %s5984_s28 = scalar_lea.hbm %s6838_s5, %s4669_s6  ;;  %s5372_s10 = scalar_lea.hbm %s6838_s5, 32768 }
  0x7c   : > { %s5367_s25 = scalar_lea.hbm %s5984_s28, 16384  ;;  %p5373_p3 = scmp.lt.u32.totalorder %s5984_s28, %s6838_s5 }
  0x7d   : > { %p5368_p2 = scmp.ne.s32.totalorder %s5984_s28, %s5367_s25  ;;  %p5374_p12 = scmp.lt.u32.totalorder %s5372_s10, %s5367_s25 }
  0x7e   : > { %p5376_p10 = scmp.lt.u32.totalorder %s5367_s25, %s5984_s28 }
  0x7f   : > { %p5370_p6 = pnand %p5368_p2, %p5943_p5  ;;  %p5375_p0 = por %p5374_p12, %p5373_p3 }
  0x81   : > { %p5371_p7 = pneg %p5370_p6  ;;  %p5377_p11 = por %p5376_p10, %p5375_p0 }
  0x83   : > { %p5378_p13 = pnand %p5377_p11, %p5371_p7 }
  0x85   : > { %5381 = shalt.err (!%p5378_p13)
}
  0x86   : > { %s5382_s13 = scalar_lea.vmem %s5988_s27, 16384  ;;  %s5661_s15 = smov [#allocation12]  }
  0x87   : > { %p5383_p8 = scmp.ne.s32.totalorder %s5988_s27, %s5382_s13  ;;  %s5387_s3 = sshll.u32 %s5661_s15, 4  ;;  %s5388_s3 = int_to_ptr.vmem [resolvable:$false] %s5387_s3 }
  0x88   : > { %s5389_s22 = scalar_lea.vmem %s5388_s3, 32768  ;;  %p5390_p2 = scmp.lt.s32.totalorder %s5988_s27, %s5388_s3 }
  0x89   : > { %p5385_p9 = pnand %p5383_p8, %p5943_p5  ;;  %p5391_p6 = scmp.lt.s32.totalorder %s5389_s22, %s5382_s13 }
  0x8b   : > { %p5386_p4 = pneg %p5385_p9  ;;  %p5392_p3 = por %p5391_p6, %p5390_p2 }
  0x8d   : > { %p5393_p12 = pnand %p5392_p3, %p5386_p4 }
  0x8f   : > { %5396 = shalt.err (!%p5393_p12)
}
  0x90   : > { %5008 = dma.hbm_to_vmem [thread:$0]  (!%p5887_p1), %s5984_s28, 16384, %s5988_s27, %s424_s24, %s5659_s11, %s5659_s11, %s5660_s29  }
  0x91   : > { %s6840_s25 = sshll.u32 %s5651_s18, 7  ;;  %s328_s13 = scalar_lea.vmem [#allocation3], %s5864_s23 }
  0x92   : > { %s6022_s6 = scalar_lea.hbm %s6758_s0, %s6840_s25  ;;  %s335_s15 = sshll.u32 %s328_s13, 4  ;;  %s6026_s15 = int_to_ptr.vmem [resolvable:$true] %s335_s15 }
  0x93   : > { %s4970_s3 = smul.u32 192, %s5922_s7  ;;  %s6841_s1 = sand.u32 1, %s5635_s14  }
  0x94   : > { %s4971_s22 = smul.u32 3072, %s5647_s17  ;;  %s325_s5 = scalar_lea.sflag [#allocation4], %s6841_s1 }
  0x95   : > { %s5397_s16 = scalar_lea.hbm %s6022_s6, 128  ;;  %p6842_p0 = scmp.ne.s32.totalorder %s6830_s21, 0 }
  0x96   : > { %p5398_p7 = scmp.ne.s32.totalorder %s6022_s6, %s5397_s16  ;;  %s5402_s27 = scalar_lea.hbm %s6758_s0, 256 }
  0x97   : > { %p6843_p10 = pneg %p6842_p0  ;;  %p5403_p8 = scmp.lt.u32.totalorder %s6022_s6, %s6758_s0 }
  0x98   : > { %p5404_p9 = scmp.lt.u32.totalorder %s5402_s27, %s5397_s16  ;;  %p5406_p2 = scmp.lt.u32.totalorder %s5397_s16, %s6022_s6 }
  0x99   : > { %p5400_p11 = pnand %p5398_p7, %p6843_p10 }
  0x9a   : > { %p5405_p4 = por %p5404_p9, %p5403_p8 }
  0x9b   : > { %p5401_p13 = pneg %p5400_p11 }
  0x9c   : > { %p5407_p6 = por %p5406_p2, %p5405_p4 }
  0x9e   : > { %p5408_p3 = pnand %p5407_p6, %p5401_p13 }
  0xa0   : > { %5411 = shalt.err (!%p5408_p3)
}
  0xa1   : > { %s5412_s1 = scalar_lea.vmem %s6026_s15, 128  ;;  %p6844_p7 = pmov %p6843_p10 }
  0xa2   : > { %p5413_p12 = scmp.ne.s32.totalorder %s6026_s15, %s5412_s1  ;;  %s5662_s23 = smov [#allocation3]  }
  0xa3   : > { %s5417_s20 = sshll.u32 %s5662_s23, 4  ;;  %s5418_s20 = int_to_ptr.vmem [resolvable:$false] %s5417_s20 }
  0xa4   : > { %p5415_p10 = pnand %p5413_p12, %p6844_p7  ;;  %s5419_s13 = scalar_lea.vmem %s5418_s20, 256 }
  0xa5   : > { %p5420_p1 = scmp.lt.s32.totalorder %s6026_s15, %s5418_s20  ;;  %p5421_p8 = scmp.lt.s32.totalorder %s5419_s13, %s5412_s1 }
  0xa6   : > { %p5416_p11 = pneg %p5415_p10 }
  0xa7   : > { %p5422_p9 = por %p5421_p8, %p5420_p1 }
  0xa9   : > { %p5423_p4 = pnand %p5422_p9, %p5416_p11 }
  0xab   : > { %5426 = shalt.err (!%p5423_p4)
}
  0xac   : > { %4993 = dma.hbm_to_vmem [thread:$0]  (!%p6842_p0), %s6022_s6, 128, %s6026_s15, %s325_s5  }
  0xad   : > { %s6059_s29 = scalar_lea.hbm %s6760_s2, %s4971_s22  ;;  %s364_s27 = scalar_lea.vmem [#allocation8], %s4970_s3 }
  0xae   : > { %s371_s25 = sshll.u32 %s364_s27, 4  ;;  %s5427_s21 = scalar_lea.hbm %s6059_s29, 3072  ;;  %s6063_s25 = int_to_ptr.vmem [resolvable:$true] %s371_s25 }
  0xaf   : > { %p5428_p1 = scmp.ne.s32.totalorder %s6059_s29, %s5427_s21  ;;  %s5432_s15 = scalar_lea.hbm %s6760_s2, 6144 }
  0xb0   : > { %p5433_p2 = scmp.lt.u32.totalorder %s6059_s29, %s6760_s2  ;;  %p5434_p6 = scmp.lt.u32.totalorder %s5432_s15, %s5427_s21 }
  0xb1   : > { %p5430_p13 = pnand %p5428_p1, %p5943_p5  ;;  %p5436_p12 = scmp.lt.u32.totalorder %s5427_s21, %s6059_s29 }
  0xb2   : > { %p5435_p3 = por %p5434_p6, %p5433_p2 }
  0xb3   : > { %p5431_p0 = pneg %p5430_p13 }
  0xb4   : > { %p5437_p7 = por %p5436_p12, %p5435_p3 }
  0xb6   : > { %p5438_p10 = pnand %p5437_p7, %p5431_p0 }
  0xb8   : > { %5441 = shalt.err (!%p5438_p10)
}
  0xb9   : > { %s5442_s3 = scalar_lea.vmem %s6063_s25, 3072  ;;  %s5663_s1 = smov [#allocation8]  }
  0xba   : > { %p5443_p11 = scmp.ne.s32.totalorder %s6063_s25, %s5442_s3  ;;  %s5447_s23 = sshll.u32 %s5663_s1, 4  ;;  %s5448_s23 = int_to_ptr.vmem [resolvable:$false] %s5447_s23 }
  0xbb   : > { %s5449_s20 = scalar_lea.vmem %s5448_s23, 6144  ;;  %p5450_p4 = scmp.lt.s32.totalorder %s6063_s25, %s5448_s23 }
  0xbc   : > { %p5445_p8 = pnand %p5443_p11, %p5943_p5  ;;  %p5451_p1 = scmp.lt.s32.totalorder %s5449_s20, %s5442_s3 }
  0xbe   : > { %p5446_p9 = pneg %p5445_p8  ;;  %p5452_p13 = por %p5451_p1, %p5450_p4 }
  0xc0   : > { %p5453_p2 = pnand %p5452_p13, %p5446_p9 }
  0xc2   : > { %5456 = shalt.err (!%p5453_p2)
}
  0xc3   : > { %s5664_s13 = smov 192   ;;  %s5665_s16 = smov 12  }
  0xc4   : > { %p6845_p0 = scmp.ne.s32.totalorder %s6832_s30, 0  ;;  %s6846_s28 = scalar_lea.sflag [#allocation7], %s5873_s9 }
  0xc5   : > { %s4354_s27 = sshll.u32 %s5922_s7, 4  ;;  %s5457_s21 = scalar_lea.hbm %s5975_s12, 16384 }
  0xc6   : > { %4999 = dma.hbm_to_vmem [thread:$0]  (!%p6845_p0), %s6059_s29, 3072, %s6063_s25, %s6846_s28, %s5664_s13, %s5664_s13, %s5665_s16  }
  0xc7   : > { %p5458_p6 = scmp.ne.s32.totalorder %s5975_s12, %s5457_s21  ;;  %s5462_s15 = scalar_lea.hbm %s6762_s4, 32768 }
  0xc8   : > { %p5463_p7 = scmp.lt.u32.totalorder %s5975_s12, %s6762_s4  ;;  %p5464_p10 = scmp.lt.u32.totalorder %s5462_s15, %s5457_s21 }
  0xc9   : > { %p5460_p3 = pnand %p5458_p6, %p5943_p5  ;;  %p5466_p8 = scmp.lt.u32.totalorder %s5457_s21, %s5975_s12 }
  0xca   : > { %p5465_p11 = por %p5464_p10, %p5463_p7 }
  0xcb   : > { %p5461_p12 = pneg %p5460_p3 }
  0xcc   : > { %p5467_p9 = por %p5466_p8, %p5465_p11 }
  0xce   : > { %p5468_p4 = pnand %p5467_p9, %p5461_p12 }
  0xd0   : > { %5471 = shalt.err (!%p5468_p4)
}
  0xd1   : > { %s5472_s29 = scalar_lea.vmem %s5979_s26, 16384  ;;  %s5666_s25 = smov [#allocation11]  }
  0xd2   : > { %p5473_p1 = scmp.ne.s32.totalorder %s5979_s26, %s5472_s29  ;;  %s5477_s3 = sshll.u32 %s5666_s25, 4  ;;  %s5478_s3 = int_to_ptr.vmem [resolvable:$false] %s5477_s3 }
  0xd3   : > { %s5479_s1 = scalar_lea.vmem %s5478_s3, 32768  ;;  %p5480_p6 = scmp.lt.s32.totalorder %s5979_s26, %s5478_s3 }
  0xd4   : > { %p5475_p13 = pnand %p5473_p1, %p5943_p5  ;;  %p5481_p3 = scmp.lt.s32.totalorder %s5479_s1, %s5472_s29 }
  0xd6   : > { %p5476_p2 = pneg %p5475_p13  ;;  %p5482_p7 = por %p5481_p3, %p5480_p6 }
  0xd8   : > { %p5483_p10 = pnand %p5482_p7, %p5476_p2 }
  0xda   : > { %5486 = shalt.err (!%p5483_p10)
}
  0xdb   : > { %s5667_s23 = smov 1024   ;;  %s6847_s20 = scalar_lea.sflag [#allocation10], %s5873_s9 }
  0xdc   : > { %5005 = dma.hbm_to_vmem [thread:$0]  (!%p6845_p0), %s5975_s12, 16384, %s5979_s26, %s6847_s20, %s5667_s23, %s5667_s23, %s5659_s11  }
  0xdd   : > { %s4671_s13 = sshll.u32 %s5647_s17, 8  ;;  %s462_s5 = scalar_lea.vmem [#allocation14], %s4354_s27 }
  0xde   : > { %s6117_s21 = scalar_lea.hbm %s6766_s8, %s4671_s13  ;;  %s470_s6 = sshll.u32 %s462_s5, 4  ;;  %s471_s6 = int_to_ptr.vmem [resolvable:$true] %s470_s6 }
  0xdf   : > { %s5487_s15 = scalar_lea.hbm %s6117_s21, 256  ;;  %s5492_s12 = scalar_lea.hbm %s6766_s8, 512 }
  0xe0   : > { %p5488_p12 = scmp.ne.s32.totalorder %s6117_s21, %s5487_s15  ;;  %p5493_p9 = scmp.lt.u32.totalorder %s6117_s21, %s6766_s8 }
  0xe1   : > { %p5494_p4 = scmp.lt.u32.totalorder %s5492_s12, %s5487_s15  ;;  %p5496_p13 = scmp.lt.u32.totalorder %s5487_s15, %s6117_s21 }
  0xe2   : > { %p5490_p11 = pnand %p5488_p12, %p5943_p5 }
  0xe3   : > { %p5495_p1 = por %p5494_p4, %p5493_p9 }
  0xe4   : > { %p5491_p8 = pneg %p5490_p11 }
  0xe5   : > { %p5497_p2 = por %p5496_p13, %p5495_p1 }
  0xe7   : > { %p5498_p6 = pnand %p5497_p2, %p5491_p8 }
  0xe9   : > { %5501 = shalt.err (!%p5498_p6)
}
  0xea   : > { %s5502_s7 = scalar_lea.vmem %s471_s6, 256  ;;  %s5668_s27 = smov [#allocation14]  }
  0xeb   : > { %p5503_p3 = scmp.ne.s32.totalorder %s471_s6, %s5502_s7  ;;  %s5507_s29 = sshll.u32 %s5668_s27, 4  ;;  %s5508_s29 = int_to_ptr.vmem [resolvable:$false] %s5507_s29 }
  0xec   : > { %s5509_s25 = scalar_lea.vmem %s5508_s29, 512  ;;  %p5510_p12 = scmp.lt.s32.totalorder %s471_s6, %s5508_s29 }
  0xed   : > { %p5505_p7 = pnand %p5503_p3, %p5943_p5  ;;  %p5511_p11 = scmp.lt.s32.totalorder %s5509_s25, %s5502_s7 }
  0xef   : > { %p5506_p10 = pneg %p5505_p7  ;;  %p5512_p0 = por %p5511_p11, %p5510_p12 }
  0xf1   : > { %p5513_p4 = pnand %p5512_p0, %p5506_p10 }
  0xf3   : > { %5516 = shalt.err (!%p5513_p4)
}
  0xf4   : > { %p6848_p9 = scmp.ne.s32.totalorder %s6832_s30, 0  ;;  %s6849_s3 = sld [smem:[#allocation38_spill]] }
  0xf6   : > { %5011 = dma.hbm_to_vmem [thread:$0]  (!%p6848_p9), %s6117_s21, 256, %s471_s6, %s424_s24  }
  0xfa   : > { %p6850_p8 = scmp.ne.s32.totalorder %s6849_s3, 0 }
  0xfb   : > { %s6851_s19 = sld [smem:[#allocation25_spill]] (!%p6850_p8)  ;;  %s6852_s1 = sld [smem:[#allocation32_spill]] (!%p6850_p8) }
  0xfc   : > { %479 = sbr.rel (%p6850_p8) target bundleno = 2958 (0xb8e), region = 56 }
 0x101   : > { %s6143_s23 = sand.u32 (!%p6850_p8), 1, %s6851_s19   ;;  %p6853_p5 = scmp.ne.s32.totalorder (!%p6850_p8), %s6852_s1, 0 }
 0x102   : > { %s6146_s20 = sshll.u32 (!%p6850_p8), %s6143_s23, 3  ;;  %s482_s13 = scalar_lea.sflag (!%p6850_p8), [#allocation4], %s6143_s23 }
 0x103   : > { %s485_s16 = scalar_lea.vmem [#allocation3], %s6146_s20 }
 0x104   : > { %5590 = dma.done.wait (%p6853_p5), %s482_s13, 128  }
 0x105   : > { %5592 = vsyncadd (%p6853_p5), %s482_s13, 4294967168  ;;  %s6854_s9 = sld [smem:[#allocation29_spill]]  ;;  %s494_s28 = scalar_lea.vmem [#allocation6], %s6146_s20 }
 0x10b   : > { %s490_s30 = sand.u32 1, %s6854_s9  }
 0x10c   : > { %s491_s24 = scalar_lea.sflag [#allocation7], %s490_s30 }
 0x10d   : > { %5594 = dma.done.wait (%p6853_p5), %s491_s24, 128  }
 0x10e   : > { %5596 = vsyncadd (%p6853_p5), %s491_s24, 4294967168  ;;  %s6855_s21 = sld [smem:[#allocation22_spill]]  ;;  %s6856_s5 = sld [smem:[#allocation35_spill]] }
 0x114   : > { %s501_s6 = sand.u32 1, %s6855_s21   ;;  %p6857_p0 = scmp.ne.s32.totalorder %s6856_s5, 0 }
 0x115   : > { %s4972_s15 = smul.u32 192, %s501_s6 }
 0x117   : > { %s6161_s26 = scalar_lea.vmem [#allocation8], %s4972_s15 }
 0x118   : > { %5598 = dma.done.wait (%p6857_p0), %s491_s24, 3072  }
 0x119   : > { %5600 = vsyncadd (%p6857_p0), %s491_s24, 4294964224  ;;  %s4360_s11 = sshll.u32 %s501_s6, 6  ;;  %s509_s12 = scalar_lea.sflag [#allocation10], %s490_s30 }
 0x11a   : > { %s6167_s22 = scalar_lea.vmem [#allocation9], %s4360_s11 }
 0x11b   : > { %5602 = dma.done.wait (%p6857_p0), %s509_s12, 17408  }
 0x11c   : > { %5604 = vsyncadd (%p6857_p0), %s509_s12, 4294949888  ;;  %s4361_s10 = sshll.u32 %s501_s6, 10  ;;  %s527_s27 = scalar_lea.sflag [#allocation13], %s490_s30 }
 0x11d   : > { %s6173_s7 = scalar_lea.vmem [#allocation11], %s4361_s10  ;;  %s6175_s29 = scalar_lea.vmem [#allocation12], %s4361_s10 }
 0x11e   : > { %5606 = dma.done.wait (%p6857_p0), %s527_s27, 16640  }
 0x11f   : > { %5608 = vsyncadd (%p6857_p0), %s527_s27, 4294950656  ;;  %s6858_s25 = sld [smem:[#allocation26_spill]]  ;;  %s4363_s3 = sshll.u32 %s501_s6, 4 }
 0x120   : > { %s6859_s21 = sld [smem:[#allocation43_spill]]  ;;  %s6860_s12 = sld [smem:[#allocation42_spill]] }
 0x121   : > { %s6193_s5 = scalar_lea.vmem [#allocation14], %s4363_s3  ;;  %s611_s27 = scalar_lea.vmem [#allocation15], %s6146_s20 }
 0x125   : > { %p612_p1 = scmp.lt.s32.totalorder %s6858_s25, 1  ;;  %p4366_p13 = scmp.ne.s32.totalorder %s6858_s25, 0 }
 0x126   : > { %v625_v0 = vld [vmem:[%s485_s16] sm:$0xff] (!%p4366_p13) }
 0x127   : > { %s613_s19 = scalar_select %p612_p1, %s6858_s25, 1 }
 0x128   : > { %624 = sbr.rel (%p4366_p13) target bundleno = 303 (0x12f), region = 88  ;;  %626 = vst [vmem:[#allocation2] sm:$0xff] (!%p4366_p13), %v625_v0 }
 0x129   : > { %s4973_s1 = smul.u32 3, %s613_s19  ;;  %s4365_s13 = sshll.u32 %s613_s19, 3 }
 0x12a   : > { %s6186_s15 = scalar_lea.vmem %s6859_s21, %s4365_s13 }
 0x12b   : > { %s6191_s10 = scalar_lea.vmem %s6860_s12, %s4973_s1 }
 0x12f PF: > { %v5117_v1 = vld [vmem:[%s6161_s26 + $0x4] ss:$12 sps:$4 sm:$0xff]   ;;  %v5119_v2 = vld [vmem:[%s6161_s26] ss:$12 sps:$4 sm:$0xff]   ;;  %v5669_v3 = vmov 0   ;;  %v5670_v4 = vmov 0.0   ;;  %v664_v29 = vlaneseq }
 0x130   : > { %839 = vmatprep.mubr.bf16.mxu0 %v5669_v3  ;;  %4882 = vmatprep.subr.bf16.mxu1 %v5670_v4  ;;  %v5120_v5 = vld [vmem:[%s6161_s26 + $0x1c] ss:$12 sps:$4 sm:$0xff]   ;;  %v5122_v6 = vld [vmem:[%s6161_s26 + $0x18] ss:$12 sps:$4 sm:$0xff]   ;;  %v5123_v7 = vld [vmem:[%s6161_s26 + $0x34] ss:$12 sps:$4 sm:$0xff]  }
 0x131   : > { %807 = vmatprep.subr.bf16.mxu0 %v5117_v1  ;;  %v5125_v8 = vld [vmem:[%s6161_s26 + $0x30] ss:$12 sps:$4 sm:$0xff]   ;;  %v5126_v9 = vld [vmem:[%s6161_s26 + $0x4c] ss:$12 sps:$4 sm:$0xff]   ;;  %v5128_v10 = vld [vmem:[%s6161_s26 + $0x48] ss:$12 sps:$4 sm:$0xff]  }
 0x132   : > { %808 = vmatpush1.bf16.msra.mxu0 %v5119_v2  ;;  %v5141_v11 = vld [vmem:[%s6161_s26 + $0x8] ss:$12 sps:$4 sm:$0xff]   ;;  %v5129_v12 = vld [vmem:[%s6161_s26 + $0x64] ss:$12 sps:$4 sm:$0xff]   ;;  %v5142_v13 = vld [vmem:[%s6161_s26 + $0x20] ss:$12 sps:$4 sm:$0xff]  }
 0x133   : > { %809 = vmatprep.subr.bf16.mxu0 %v5120_v5  ;;  %4883 = vmatpush3.bf16.msra.mxu1 %v5141_v11  ;;  %v5131_v14 = vld [vmem:[%s6161_s26 + $0x60] ss:$12 sps:$4 sm:$0xff]   ;;  %v5132_v15 = vld [vmem:[%s6161_s26 + $0x7c] ss:$12 sps:$4 sm:$0xff]   ;;  %v5134_v16 = vld [vmem:[%s6161_s26 + $0x78] ss:$12 sps:$4 sm:$0xff]  }
 0x134   : > { %4884 = vmatprep.subr.bf16.mxu1 %v5670_v4  ;;  %v5143_v17 = vld [vmem:[%s6161_s26 + $0x38] ss:$12 sps:$4 sm:$0xff]   ;;  %v5135_v18 = vld [vmem:[%s6161_s26 + $0x94] ss:$12 sps:$4 sm:$0xff]   ;;  %v5144_v19 = vld [vmem:[%s6161_s26 + $0x50] ss:$12 sps:$4 sm:$0xff]  }
 0x135   : > { %v5137_v20 = vld [vmem:[%s6161_s26 + $0x90] ss:$12 sps:$4 sm:$0xff]   ;;  %v5138_v21 = vld [vmem:[%s6161_s26 + $0xac] ss:$12 sps:$4 sm:$0xff]   ;;  %v5145_v22 = vld [vmem:[%s6161_s26 + $0x68] ss:$12 sps:$4 sm:$0xff]  }
 0x136   : > { %810 = vmatpush1.bf16.msra.mxu0 %v5122_v6  ;;  %v5140_v23 = vld [vmem:[%s6161_s26 + $0xa8] ss:$12 sps:$4 sm:$0xff]   ;;  %v627_v24 = vld [vmem:[#allocation2] sm:$0xff]  ;;  %v5146_v25 = vld [vmem:[%s6161_s26 + $0x80] ss:$12 sps:$4 sm:$0xff]   ;;  %vm5671_vm0 = vmmov 0  }
 0x137   : > { %811 = vmatprep.subr.bf16.mxu0 %v5123_v7  ;;  %4885 = vmatpush3.bf16.msra.mxu1 %v5142_v13  ;;  %v629_v26 = vpack.c.bf16 %v627_v24, %v627_v24  ;;  %v5147_v27 = vld [vmem:[%s6161_s26 + $0x98] ss:$12 sps:$4 sm:$0xff]   ;;  %v5148_v28 = vld [vmem:[%s6161_s26 + $0xb0] ss:$12 sps:$4 sm:$0xff]   ;;  %v6240_v30 = vshrl.u32 %v664_v29, 7  ;;  %vm927_vm1 = vcmask 261120  }
 0x138   : > { %4886 = vmatprep.subr.bf16.mxu1 %v5670_v4  ;;  %4898 = vmatprep.mubr.msk.bf16.mxu1 %vm5671_vm0, %v5670_v4  ;;  %v662_v32 = vld [vmem:[%s6191_s10] sm:$0x7]  ;;  %s5672_s16 = smov 64   ;;  %s5673_s6 = smov 96   ;;  %vm1168_vm2 = vcmask 1043456   ;;  %vm1112_vm3 = vcmask 64512  }
 0x139   : > { %v6243_v31 = vsub.s32 1, %v6240_v30  ;;  %v6247_v33 = vsub.s32 0, %v6240_v30  ;;  %s5674_s26 = smov 32   ;;  %v6263_v45 = vsub.s32 2, %v6240_v30  ;;  %v926_v7 = vld [vmem:[%s494_s28] sm:$0xff]  ;;  %vm1363_vm4 = vcmask 523264  }
 0x13a   : > { %812 = vmatpush1.bf16.msra.mxu0 %v5125_v8  ;;  %vm1365_vm5 = vcmask 785408   ;;  %s6861_s28 = sld [smem:[#allocation26_spill]] }
 0x13b   : > { %813 = vmatprep.subr.bf16.mxu0 %v5126_v9  ;;  %4887 = vmatpush3.bf16.msra.mxu1 %v5143_v17  ;;  %v671_v34 = vrot.slane %v662_v32, %v6243_v31  ;;  %v667_v37 = vrot.slane %v662_v32, %v6247_v33  ;;  %v675_v50 = vrot.slane %v662_v32, %v6263_v45 }
 0x13c   : > { %4888 = vmatprep.subr.bf16.mxu1 %v5670_v4 }
 0x13e   : > { %814 = vmatpush1.bf16.msra.mxu0 %v5128_v10 }
 0x13f   : > { %815 = vmatprep.subr.bf16.mxu0 %v5129_v12  ;;  %4889 = vmatpush3.bf16.msra.mxu1 %v5144_v19 }
 0x140   : > { %4890 = vmatprep.subr.bf16.mxu1 %v5670_v4  ;;  %p4663_p2 = scmp.ne.s32.totalorder %s6861_s28, 1 }
 0x142   : > { %816 = vmatpush1.bf16.msra.mxu0 %v5131_v14 }
 0x143   : > { %817 = vmatprep.subr.bf16.mxu0 %v5132_v15  ;;  %4891 = vmatpush3.bf16.msra.mxu1 %v5145_v22 }
 0x144   : > { %4892 = vmatprep.subr.bf16.mxu1 %v5670_v4 }
 0x146   : > { %818 = vmatpush1.bf16.msra.mxu0 %v5134_v16 }
 0x147   : > { %819 = vmatprep.subr.bf16.mxu0 %v5135_v18  ;;  %4893 = vmatpush3.bf16.msra.mxu1 %v5146_v25 }
 0x148   : > { %4894 = vmatprep.subr.bf16.mxu1 %v5670_v4 }
 0x14a   : > { %820 = vmatpush1.bf16.msra.mxu0 %v5137_v20 }
 0x14b   : > { %821 = vmatprep.subr.bf16.mxu0 %v5138_v21  ;;  %4895 = vmatpush3.bf16.msra.mxu1 %v5147_v27 }
 0x14c   : > { %4896 = vmatprep.subr.bf16.mxu1 %v5670_v4 }
 0x14e   : > { %822 = vmatpush1.bf16.msra.mxu0 %v5140_v23 }
 0x14f   : > { %4926 = vmatprep.subr.bf16.mxu0 %v5670_v4  ;;  %4897 = vmatpush3.bf16.msra.mxu1 %v5148_v28 }
 0x150   : > { %4902 = vmatprep.subr.bf16.mxu1 %v5670_v4 }
 0x151   : > { %840 = vmatmul.mubr.bf16.vlgmr.msra.gmra.mrb[0].mxu0 %v629_v26 }
 0x152   : > { %4928 = vmatprep.mubr.msk.bf16.mxu0 %vm5671_vm0, %v5670_v4  ;;  %4899 = vmatmul.mubr.bf16.vlgmr.msra.gmra.mrb[0].mxu1 %v629_v26 }
 0x153   : > { %4904 = vmatprep.mubr.msk.bf16.mxu1 %vm5671_vm0, %v5670_v4 }
 0x224   : > { %v841_v35 = vpop.f32.mrb[0].mxu0 }
 0x225   : > { %v843_v36 = vpop.f32.mrb[1].mxu0  ;;  %v842_v42 = vadd.f32 %v841_v35, %v667_v37  ;;  %v882_v46 = vpop.f32.mrb[0].mxu1 }
 0x226   : > { %v844_v38 = vadd.f32 %v843_v36, %v671_v34  ;;  %v845_v39 = vpop.f32.mrb[2].mxu0  ;;  %v4900_v47 = vpop.f32.mrb[1].mxu1  ;;  %v6266_v51 = vadd.f32 %v882_v46, %v675_v50 }
 0x227   : > { %v846_v40 = vpop.f32.mrb[3].mxu0  ;;  %v918_v44 = vpack.c.bf16 %v842_v42, %v842_v42  ;;  %v885_v48 = vpop.f32.mrb[2].mxu1 }
 0x228   : > { %902 = vrot.lane.b32.xlu1 %v844_v38, %s5672_s16  ;;  %899 = vrot.lane.b32.xlu0 %v844_v38, %s5673_s6  ;;  %v922_v41 = vpack.c.bf16 %v844_v38, %v844_v38  ;;  %v4901_v49 = vpop.f32.mrb[3].mxu1  ;;  %v1161_v52 = vpack.c.bf16 %v6266_v51, %v6266_v51 }
 0x22a   : > { %v932_v43 = vsel %vm927_vm1, %v922_v41, 0  ;;  %v1170_v53 = vsel %vm1168_vm2, %v1161_v52, 0 }
 0x22b   : > { %4903 = vmatpush3.bf16.xpose.msra.mxu1 %v932_v43  ;;  %4927 = vmatpush3.bf16.msra.mxu0 %v1170_v53 }
 0x22c   : > { %892 = vrot.lane.b32.xlu1 %v842_v42, %s5672_s16  ;;  %889 = vrot.lane.b32.xlu0 %v842_v42, %s5673_s6 }
 0x22d   : > { %4908 = vmatprep.subr.bf16.mxu1 %v5670_v4  ;;  %4938 = vmatprep.subr.bf16.mxu0 %v5670_v4 }
 0x230   : > { %895 = vrot.lane.b32.xlu1 %v842_v42, %s5674_s26  ;;  %905 = vrot.lane.b32.xlu0 %v844_v38, %s5674_s26 }
 0x232   : > { %4905 = vmatmul.mubr.msk.bf16.vlgmr.msra.gmra.mrb[4].mxu1 %vm927_vm1, %v918_v44 }
 0x233   : > { %4910 = vmatprep.mubr.msk.bf16.mxu1 %vm5671_vm0, %v5670_v4 }
 0x29a   : > { %v900_v54 = vpop.permute.xlu0 %899  ;;  %v903_v57 = vpop.permute.xlu1 %902 }
 0x29b   : > { %v923_v55 = vpack.c.bf16 %v900_v54, %v900_v54  ;;  %v924_v59 = vpack.c.bf16 %v903_v57, %v903_v57 }
 0x29d   : > { %v978_v56 = vsel %vm927_vm1, %v923_v55, 0  ;;  %v1024_v61 = vsel %vm927_vm1, %v924_v59, 0 }
 0x29e   : > { %4909 = vmatpush3.bf16.xpose.msra.mxu1 %v978_v56  ;;  %v890_v58 = vpop.permute.xlu0 %889  ;;  %v893_v63 = vpop.permute.xlu1 %892 }
 0x29f   : > { %4914 = vmatprep.subr.bf16.mxu1 %v5670_v4  ;;  %v919_v60 = vpack.c.bf16 %v890_v58, %v890_v58  ;;  %v920_v1 = vpack.c.bf16 %v893_v63, %v893_v63 }
 0x2a2   : > { %v906_v62 = vpop.permute.xlu0 %905  ;;  %v896_v5 = vpop.permute.xlu1 %895 }
 0x2a3   : > { %v925_v0 = vpack.c.bf16 %v906_v62, %v906_v62  ;;  %v921_v6 = vpack.c.bf16 %v896_v5, %v896_v5 }
 0x2a5   : > { %4911 = vmatmul.mubr.msk.bf16.vlgmr.msra.gmra.mrb[8].mxu1 %vm927_vm1, %v919_v60  ;;  %v1070_v2 = vsel %vm927_vm1, %v925_v0, 0 }
 0x2a6   : > { %4915 = vmatpush3.bf16.xpose.msra.mxu1 %v1024_v61  ;;  %4916 = vmatprep.mubr.msk.bf16.mxu1 %vm5671_vm0, %v5670_v4 }
 0x2a7   : > { %4920 = vmatprep.subr.bf16.mxu1 %v5670_v4 }
 0x2ad   : > { %4917 = vmatmul.mubr.msk.bf16.vlgmr.msra.gmra.mrb[12].mxu1 %vm927_vm1, %v920_v1 }
 0x2ae   : > { %4921 = vmatpush3.bf16.xpose.msra.mxu1 %v1070_v2  ;;  %4922 = vmatprep.mubr.msk.bf16.mxu1 %vm5671_vm0, %v5670_v4 }
 0x2af   : > { %4932 = vmatprep.subr.bf16.mxu1 %v5670_v4 }
 0x2b5   : > { %4923 = vmatmul.mubr.msk.bf16.vlgmr.msra.gmra.mrb[16].mxu1 %vm927_vm1, %v921_v6 }
 0x2b6   : > { %4934 = vmatprep.mubr.msk.bf16.mxu1 %vm5671_vm0, %v5670_v4 }
 0x305   : > { %v968_v8 = vpop.f32.mrb[4].mxu1 }
 0x306   : > { %v969_v9 = vadd.f32 %v968_v8, %v926_v7  ;;  %v4906_v10 = vpop.f32.mrb[5].mxu1 }
 0x307   : > { %v971_v11 = vpop.f32.mrb[6].mxu1 }
 0x308   : > { %v4907_v12 = vpop.f32.mrb[7].mxu1  ;;  %v1113_v13 = vsel %vm1112_vm3, %v969_v9, -inf }
 0x309   : > { %1114 = vmax.xlane.f32.xlu0 %v1113_v13 }
 0x378   : > { %v1014_v14 = vpop.f32.mrb[8].mxu1 }
 0x379   : > { %v1015_v15 = vadd.f32 %v1014_v14, %v926_v7  ;;  %v4912_v16 = vpop.f32.mrb[9].mxu1 }
 0x37a   : > { %v1017_v17 = vpop.f32.mrb[10].mxu1 }
 0x37b   : > { %v4913_v18 = vpop.f32.mrb[11].mxu1  ;;  %v1116_v19 = vsel %vm1112_vm3, %v1015_v15, -inf }
 0x37c   : > { %1117 = vmax.xlane.f32.xlu1 %v1116_v19  ;;  %v5149_v19 = vld [vmem:[%s6167_s22] sm:$0xff]  }
 0x380   : > { %v1060_v20 = vpop.f32.mrb[12].mxu1 }
 0x381   : > { %v1061_v21 = vadd.f32 %v1060_v20, %v926_v7  ;;  %v4918_v22 = vpop.f32.mrb[13].mxu1  ;;  %v5150_v20 = vld [vmem:[%s6167_s22 + $0x8] sm:$0xff]  }
 0x382   : > { %v1063_v23 = vpop.f32.mrb[14].mxu1 }
 0x383   : > { %v4919_v24 = vpop.f32.mrb[15].mxu1  ;;  %v1119_v25 = vsel %vm1112_vm3, %v1061_v21, -inf }
 0x384   : > { %1120 = vmax.xlane.f32.xlu0 %v1119_v25  ;;  %v5151_v24 = vld [vmem:[%s6167_s22 + $0x10] sm:$0xff]  }
 0x388   : > { %v1106_v26 = vpop.f32.mrb[16].mxu1 }
 0x389   : > { %v1107_v27 = vadd.f32 %v1106_v26, %v926_v7  ;;  %v4924_v28 = vpop.f32.mrb[17].mxu1  ;;  %v5152_v26 = vld [vmem:[%s6167_s22 + $0x18] sm:$0xff]  }
 0x38a   : > { %v1109_v29 = vpop.f32.mrb[18].mxu1  ;;  %v5154_v28 = vld [vmem:[%s6167_s22 + $0x28] sm:$0xff]  }
 0x38b   : > { %v4925_v32 = vpop.f32.mrb[19].mxu1  ;;  %v1122_v34 = vsel %vm1112_vm3, %v1107_v27, -inf  ;;  %v5155_v29 = vld [vmem:[%s6167_s22 + $0x30] sm:$0xff]  }
 0x38c   : > { %1123 = vmax.xlane.f32.xlu0 %v1122_v34 }
 0x38d   : > { %909 = vrot.lane.b32.xlu1 %v6266_v51, %s5673_s6 }
 0x396   : > { %v1115_v35 = vpop.xlane.xlu0 %1114 }
 0x397   : > { %v1125_v36 = vsub.f32 %v969_v9, %v1115_v35 }
 0x399   : > { %v1129_v37 = vmul.f32 1.442695, %v1125_v36 }
 0x39b   : > { %5285 = vpow2.f32 %v1129_v37  ;;  %v5156_v37 = vld [vmem:[%s6167_s22 + $0x38] sm:$0xff]  }
 0x3a5   : > { %v5286_v38 = vpop.eup %5285 }
 0x3a6   : > { %v1137_v39 = vsel %vm1112_vm3, %v5286_v38, 0.0 }
 0x3b1   : > { %1138 = vadd.xlane.f32.xlu1 %v1137_v39 }
 0x409   : > { %v1118_v40 = vpop.xlane.xlu1 %1117 }
 0x40a   : > { %v1126_v41 = vsub.f32 %v1015_v15, %v1118_v40 }
 0x40c   : > { %v1131_v42 = vmul.f32 1.442695, %v1126_v41 }
 0x40d   : > { %v910_v43 = vpop.permute.xlu1 %909 }
 0x40e   : > { %5287 = vpow2.f32 %v1131_v42  ;;  %v1162_v44 = vpack.c.bf16 %v910_v43, %v910_v43 }
 0x410   : > { %v1216_v46 = vsel %vm1168_vm2, %v1162_v44, 0 }
 0x411   : > { %4933 = vmatpush3.bf16.msra.mxu1 %v1216_v46  ;;  %v1121_v47 = vpop.xlane.xlu0 %1120 }
 0x412   : > { %v1127_v48 = vsub.f32 %v1061_v21, %v1121_v47  ;;  %4944 = vmatprep.subr.bf16.mxu1 %v5670_v4 }
 0x414   : > { %v1133_v49 = vmul.f32 1.442695, %v1127_v48 }
 0x416   : > { %5289 = vpow2.f32 %v1133_v49 }
 0x418   : > { %v5288_v50 = vpop.eup %5287 }
 0x419   : > { %v1124_v52 = vpop.xlane.xlu0 %1123  ;;  %v1140_v53 = vsel %vm1112_vm3, %v5288_v50, 0.0 }
 0x41a   : > { %v1128_v54 = vsub.f32 %v1107_v27, %v1124_v52  ;;  %1141 = vadd.xlane.f32.xlu0 %v1140_v53  ;;  %v5153_v27 = vld [vmem:[%s6167_s22 + $0x20] sm:$0xff]  }
 0x41c   : > { %v1135_v55 = vmul.f32 1.442695, %v1128_v54  ;;  %v6340_v54 = vld [vmem:[%s6186_s15] sm:$0xff] }
 0x41e   : > { %5291 = vpow2.f32 %v1135_v55  ;;  %v1387_v55 = vrot.slane %v6340_v54, %v6247_v33 }
 0x420   : > { %v5290_v56 = vpop.eup %5289 }
 0x421   : > { %v1143_v57 = vsel %vm1112_vm3, %v5290_v56, 0.0 }
 0x422   : > { %1144 = vadd.xlane.f32.xlu1 %v1143_v57 }
 0x428   : > { %v5292_v58 = vpop.eup %5291 }
 0x429   : > { %v1146_v59 = vsel %vm1112_vm3, %v5292_v58, 0.0 }
 0x42a   : > { %1147 = vadd.xlane.f32.xlu0 %v1146_v59 }
 0x433   : > { %915 = vrot.lane.b32.xlu1 %v6266_v51, %s5674_s26 }
 0x43e   : > { %v1139_v60 = vpop.xlane.xlu1 %1138 }
 0x43f   : > { %5293 = vrcp.f32 %v1139_v60 }
 0x440   : > { %912 = vrot.lane.b32.xlu0 %v6266_v51, %s5672_s16 }
 0x449   : > { %v5294_v61 = vpop.eup %5293 }
 0x44a   : > { %v1153_v62 = vmul.f32 %v5294_v61, %v5286_v38  ;;  %v5305_v61 = vld [vmem:[#allocation2] sm:$0xff] }
 0x44c   : > { %v1157_v63 = vpack.c.bf16 %v1153_v62, %v1153_v62 }
 0x44e   : > { %4929 = vmatmul.mubr.msk.bf16.vlgmr.msra.gmra.mrb[4].mxu0 %vm1112_vm3, %v1157_v63  ;;  %v1500_v63 = vld [vmem:[%s6173_s7] sm:$0xff] }
 0x44f   : > { %4940 = vmatprep.mubr.msk.bf16.mxu0 %vm5671_vm0, %v5670_v4 }
 0x4a7   : > { %v1142_v0 = vpop.xlane.xlu0 %1141 }
 0x4a8   : > { %5295 = vrcp.f32 %v1142_v0  ;;  %v1508_v0 = vld [vmem:[%s6173_s7 + $0x40] sm:$0xff] }
 0x4af   : > { %v1145_v1 = vpop.xlane.xlu1 %1144 }
 0x4b0   : > { %5297 = vrcp.f32 %v1145_v1  ;;  %v1501_v1 = vld [vmem:[%s6173_s7 + $0x8] sm:$0xff] }
 0x4b2   : > { %v5296_v2 = vpop.eup %5295 }
 0x4b3   : > { %v1154_v5 = vmul.f32 %v5296_v2, %v5288_v50  ;;  %v916_v6 = vpop.permute.xlu1 %915  ;;  %v4407_v2 = vcombine.low %v1500_v63, %v1508_v0 }
 0x4b4   : > { %v1164_v7 = vpack.c.bf16 %v916_v6, %v916_v6  ;;  %v1509_v6 = vld [vmem:[%s6173_s7 + $0x48] sm:$0xff] }
 0x4b5   : > { %v1158_v8 = vpack.c.bf16 %v1154_v5, %v1154_v5  ;;  %v4408_v5 = vcombine.high %v1500_v63, %v1508_v0 }
 0x4b6   : > { %v1308_v9 = vsel %vm1168_vm2, %v1164_v7, 0  ;;  %v1516_v7 = vld [vmem:[%s6173_s7 + $0x80] sm:$0xff] }
 0x4b7   : > { %4935 = vmatmul.mubr.msk.bf16.vlgmr.msra.gmra.mrb[20].mxu1 %vm1112_vm3, %v1158_v8  ;;  %v1148_v51 = vpop.xlane.xlu0 %1147  ;;  %v1524_v8 = vld [vmem:[%s6173_s7 + $0xc0] sm:$0xff] }
 0x4b8   : > { %4945 = vmatpush3.bf16.msra.mxu1 %v1308_v9  ;;  %5299 = vrcp.f32 %v1148_v51  ;;  %4946 = vmatprep.mubr.msk.bf16.mxu1 %vm5671_vm0, %v5670_v4  ;;  %v4409_v9 = vcombine.low %v1501_v1, %v1509_v6  ;;  %v4410_v51 = vcombine.high %v1501_v1, %v1509_v6  ;;  %v1612_v1 = vld [vmem:[%s6173_s7 + $0x380] sm:$0xff] }
 0x4b9   : > { %2352 = vmatprep.subr.bf16.mxu1 %v4408_v5  ;;  %v1613_v5 = vld [vmem:[%s6173_s7 + $0x388] sm:$0xff] }
 0x4ba   : > { %v5298_v10 = vpop.eup %5297 }
 0x4bb   : > { %v913_v11 = vpop.permute.xlu0 %912  ;;  %v1155_v12 = vmul.f32 %v5298_v10, %v5290_v56  ;;  %v4424_v10 = vcombine.high %v1516_v7, %v1524_v8 }
 0x4bc   : > { %v1163_v13 = vpack.c.bf16 %v913_v11, %v913_v11  ;;  %v1517_v11 = vld [vmem:[%s6173_s7 + $0x88] sm:$0xff] }
 0x4bd   : > { %v1159_v15 = vpack.c.bf16 %v1155_v12, %v1155_v12  ;;  %v1525_v12 = vld [vmem:[%s6173_s7 + $0xc8] sm:$0xff] }
 0x4be   : > { %v1262_v14 = vsel %vm1168_vm2, %v1163_v13, 0  ;;  %v1532_v13 = vld [vmem:[%s6173_s7 + $0x100] sm:$0xff] }
 0x4bf   : > { %4939 = vmatpush3.bf16.msra.mxu0 %v1262_v14  ;;  %v4426_v14 = vcombine.high %v1517_v11, %v1525_v12 }
 0x4c0   : > { %4950 = vmatprep.subr.bf16.mxu0 %v5670_v4 }
 0x4c2   : > { %v5300_v16 = vpop.eup %5299  ;;  %4941 = vmatmul.mubr.msk.bf16.vlgmr.msra.gmra.mrb[8].mxu0 %vm1112_vm3, %v1159_v15  ;;  %v1540_v15 = vld [vmem:[%s6173_s7 + $0x140] sm:$0xff] }
 0x4c3   : > { %v1156_v17 = vmul.f32 %v5300_v16, %v5292_v58  ;;  %4966 = vmatprep.mubr.msk.bf16.mxu0 %vm5671_vm0, %v5670_v4  ;;  %4951 = vmatpush3.bf16.msra.mxu0 %v5149_v19  ;;  %v1533_v16 = vld [vmem:[%s6173_s7 + $0x108] sm:$0xff]  ;;  %v4425_v19 = vcombine.low %v1517_v11, %v1525_v12  ;;  %v1510_v11 = vld [vmem:[%s6173_s7 + $0x50] sm:$0xff]  ;;  %v1503_v12 = vld [vmem:[%s6173_s7 + $0x18] sm:$0xff] }
 0x4c4   : > { %4952 = vmatprep.subr.bf16.mxu0 %v5670_v4 }
 0x4c5   : > { %v1160_v18 = vpack.c.bf16 %v1156_v17, %v1156_v17  ;;  %v1541_v17 = vld [vmem:[%s6173_s7 + $0x148] sm:$0xff] }
 0x4c7   : > { %4947 = vmatmul.mubr.msk.bf16.vlgmr.msra.gmra.mrb[24].mxu1 %vm1112_vm3, %v1160_v18  ;;  %4953 = vmatpush3.bf16.msra.mxu0 %v5150_v20  ;;  %v4423_v18 = vcombine.low %v1516_v7, %v1524_v8  ;;  %v4440_v20 = vcombine.high %v1532_v13, %v1540_v15  ;;  %v1621_v7 = vld [vmem:[%s6173_s7 + $0x3c8] sm:$0xff] }
 0x4c8   : > { %2384 = vmatprep.mubr.bf16.mxu1 %v5669_v3  ;;  %4954 = vmatprep.subr.bf16.mxu0 %v5670_v4 }
 0x4c9   : > { %2353 = vmatpush1.bf16.msra.mxu1 %v4407_v2  ;;  %v1620_v2 = vld [vmem:[%s6173_s7 + $0x3c0] sm:$0xff] }
 0x4ca   : > { %2354 = vmatprep.subr.bf16.mxu1 %v4424_v10  ;;  %v4520_v6 = vcombine.high %v1612_v1, %v1620_v2  ;;  %v4519_v8 = vcombine.low %v1612_v1, %v1620_v2  ;;  %v1502_v10 = vld [vmem:[%s6173_s7 + $0x10] sm:$0xff]  ;;  %v1591_v1 = vld [vmem:[%s6173_s7 + $0x2d8] sm:$0xff] }
 0x4cb   : > { %4955 = vmatpush3.bf16.msra.mxu0 %v5151_v24 }
 0x4cc   : > { %4956 = vmatprep.subr.bf16.mxu0 %v5670_v4 }
 0x4cd   : > { %2355 = vmatpush1.bf16.msra.mxu1 %v4423_v18 }
 0x4ce   : > { %2356 = vmatprep.subr.bf16.mxu1 %v4440_v20 }
 0x4cf   : > { %4957 = vmatpush3.bf16.msra.mxu0 %v5152_v26 }
 0x4d0   : > { %4958 = vmatprep.subr.bf16.mxu0 %v5670_v4 }
 0x4d3   : > { %4959 = vmatpush3.bf16.msra.mxu0 %v5153_v27 }
 0x4d4   : > { %4960 = vmatprep.subr.bf16.mxu0 %v5670_v4 }
 0x4d7   : > { %4961 = vmatpush3.bf16.msra.mxu0 %v5154_v28  ;;  %v1548_v28 = vld [vmem:[%s6173_s7 + $0x180] sm:$0xff] }
 0x4d8   : > { %4962 = vmatprep.subr.bf16.mxu0 %v5670_v4 }
 0x4db   : > { %4963 = vmatpush3.bf16.msra.mxu0 %v5155_v29  ;;  %v1556_v29 = vld [vmem:[%s6173_s7 + $0x1c0] sm:$0xff] }
 0x4dc   : > { %4964 = vmatprep.subr.bf16.mxu0 %v5670_v4 }
 0x4df   : > { %4965 = vmatpush3.bf16.msra.mxu0 %v5156_v37 }
 0x4e0   : > { %2393 = vmatprep.subr.bf16.mxu0 %v4410_v51  ;;  %v4522_v51 = vcombine.high %v1613_v5, %v1621_v7 }
 0x521   : > { %v1206_v21 = vpop.f32.mrb[4].mxu0 }
 0x522   : > { %v4930_v22 = vpop.f32.mrb[5].mxu0 }
 0x523   : > { %v1209_v23 = vpop.f32.mrb[6].mxu0  ;;  %v4439_v22 = vcombine.low %v1532_v13, %v1540_v15  ;;  %v4411_v13 = vcombine.low %v1502_v10, %v1510_v11  ;;  %v1511_v15 = vld [vmem:[%s6173_s7 + $0x58] sm:$0xff] }
 0x524   : > { %v4931_v25 = vpop.f32.mrb[7].mxu0  ;;  %v4441_v23 = vcombine.low %v1533_v16, %v1541_v17 }
 0x525   : > { %2357 = vmatpush1.bf16.msra.mxu1 %v4439_v22 }
 0x58a   : > { %v1252_v32 = vpop.f32.mrb[20].mxu1 }
 0x58b   : > { %1351 = vrot.lane.b32.xlu1 %v1252_v32, %s5674_s26  ;;  %v4936_v34 = vpop.f32.mrb[21].mxu1  ;;  %v1549_v32 = vld [vmem:[%s6173_s7 + $0x188] sm:$0xff] }
 0x58c   : > { %v1255_v35 = vpop.f32.mrb[22].mxu1  ;;  %v4456_v34 = vcombine.high %v1548_v28, %v1556_v29 }
 0x58d   : > { %v4937_v36 = vpop.f32.mrb[23].mxu1  ;;  %v1557_v35 = vld [vmem:[%s6173_s7 + $0x1c8] sm:$0xff] }
 0x58e   : > { %v4455_v36 = vcombine.low %v1548_v28, %v1556_v29  ;;  %v4457_v37 = vcombine.low %v1549_v32, %v1557_v35  ;;  %2358 = vmatprep.subr.bf16.mxu1 %v4456_v34  ;;  %v1526_v28 = vld [vmem:[%s6173_s7 + $0xd0] sm:$0xff]  ;;  %v1519_v29 = vld [vmem:[%s6173_s7 + $0x98] sm:$0xff] }
 0x590   : > { %2359 = vmatpush1.bf16.msra.mxu1 %v4455_v36 }
 0x595   : > { %v1298_v38 = vpop.f32.mrb[8].mxu0 }
 0x596   : > { %1355 = vrot.lane.b32.xlu0 %v1298_v38, %s5672_s16  ;;  %v4942_v39 = vpop.f32.mrb[9].mxu0  ;;  %v4458_v38 = vcombine.high %v1549_v32, %v1557_v35  ;;  %v1527_v32 = vld [vmem:[%s6173_s7 + $0xd8] sm:$0xff] }
 0x597   : > { %v1301_v40 = vpop.f32.mrb[10].mxu0  ;;  %v1564_v39 = vld [vmem:[%s6173_s7 + $0x200] sm:$0xff] }
 0x598   : > { %v4943_v41 = vpop.f32.mrb[11].mxu0  ;;  %v1572_v40 = vld [vmem:[%s6173_s7 + $0x240] sm:$0xff] }
 0x599   : > { %v1565_v41 = vld [vmem:[%s6173_s7 + $0x208] sm:$0xff] }
 0x59a   : > { %v1344_v42 = vpop.f32.mrb[24].mxu1 }
 0x59b   : > { %1359 = vrot.lane.b32.xlu1 %v1344_v42, %s5673_s6  ;;  %v4948_v43 = vpop.f32.mrb[25].mxu1  ;;  %v4472_v42 = vcombine.high %v1564_v39, %v1572_v40 }
 0x59c   : > { %v1347_v44 = vpop.f32.mrb[26].mxu1  ;;  %v1573_v43 = vld [vmem:[%s6173_s7 + $0x248] sm:$0xff] }
 0x59d   : > { %v4949_v46 = vpop.f32.mrb[27].mxu1  ;;  %v4471_v44 = vcombine.low %v1564_v39, %v1572_v40  ;;  %2360 = vmatprep.subr.bf16.mxu1 %v4472_v42  ;;  %v1543_v39 = vld [vmem:[%s6173_s7 + $0x158] sm:$0xff] }
 0x59e   : > { %v4473_v46 = vcombine.low %v1565_v41, %v1573_v43 }
 0x59f   : > { %2361 = vmatpush1.bf16.msra.mxu1 %v4471_v44  ;;  %v1550_v44 = vld [vmem:[%s6173_s7 + $0x190] sm:$0xff] }
 0x5fd   : > { %v1352_v47 = vpop.permute.xlu1 %1351 }
 0x5fe   : > { %v1362_v4 = vsel %vm927_vm1, %v1206_v21, %v1352_v47  ;;  %v4442_v21 = vcombine.high %v1533_v16, %v1541_v17  ;;  %v4474_v47 = vcombine.high %v1565_v41, %v1573_v43  ;;  %v4413_v16 = vcombine.low %v1503_v12, %v1511_v15 }
 0x5ff   : > { %v4414_v17 = vcombine.high %v1503_v12, %v1511_v15  ;;  %v4429_v41 = vcombine.low %v1519_v29, %v1527_v32  ;;  %v1614_v15 = vld [vmem:[%s6173_s7 + $0x390] sm:$0xff] }
 0x608   : > { %v1356_v48 = vpop.permute.xlu0 %1355 }
 0x609   : > { %v1364_v49 = vsel %vm1363_vm4, %v1362_v4, %v1356_v48  ;;  %v1580_v48 = vld [vmem:[%s6173_s7 + $0x280] sm:$0xff] }
 0x60a   : > { %v1588_v4 = vld [vmem:[%s6173_s7 + $0x2c0] sm:$0xff] }
 0x60d   : > { %v1360_v50 = vpop.permute.xlu1 %1359 }
 0x60e   : > { %v1366_v52 = vsel %vm1365_vm5, %v1364_v49, %v1360_v50  ;;  %v1581_v49 = vld [vmem:[%s6173_s7 + $0x288] sm:$0xff]  ;;  %v4488_v50 = vcombine.high %v1580_v48, %v1588_v4 }
 0x60f   : > { %v1367_v53 = vpack.c.bf16 %v1366_v52, %v1366_v52  ;;  %v1589_v52 = vld [vmem:[%s6173_s7 + $0x2c8] sm:$0xff] }
 0x610   : > { %2362 = vmatprep.subr.bf16.mxu1 %v4488_v50 }
 0x611   : > { %4967 = vmatmul.mubr.bf16.vlgmr.msra.gmra.mrb[12].mxu0 %v1367_v53  ;;  %v4487_v53 = vcombine.low %v1580_v48, %v1588_v4  ;;  %v1559_v48 = vld [vmem:[%s6173_s7 + $0x1d8] sm:$0xff] }
 0x612   : > { %2425 = vmatprep.mubr.bf16.mxu0 %v5669_v3  ;;  %2394 = vmatpush1.bf16.msra.mxu0 %v4409_v9  ;;  %v4521_v9 = vcombine.low %v1613_v5, %v1621_v7 }
 0x613   : > { %2395 = vmatprep.subr.bf16.mxu0 %v4426_v14  ;;  %2363 = vmatpush1.bf16.msra.mxu1 %v4487_v53  ;;  %v4412_v14 = vcombine.high %v1502_v10, %v1510_v11  ;;  %v1566_v53 = vld [vmem:[%s6173_s7 + $0x210] sm:$0xff]  ;;  %v1607_v10 = vld [vmem:[%s6173_s7 + $0x358] sm:$0xff] }
 0x616   : > { %2396 = vmatpush1.bf16.msra.mxu0 %v4425_v19 }
 0x617   : > { %2397 = vmatprep.subr.bf16.mxu0 %v4442_v21  ;;  %v1492_v21 = vrot.slane %v6340_v54, %v6243_v31 }
 0x61a   : > { %2398 = vmatpush1.bf16.msra.mxu0 %v4441_v23  ;;  %v1497_v23 = vrot.slane %v6340_v54, %v6263_v45  ;;  %v1542_v54 = vld [vmem:[%s6173_s7 + $0x150] sm:$0xff] }
 0x61b   : > { %2399 = vmatprep.subr.bf16.mxu0 %v4458_v38  ;;  %v1534_v38 = vld [vmem:[%s6173_s7 + $0x110] sm:$0xff] }
 0x61c   : > { %v4444_v42 = vcombine.high %v1534_v38, %v1542_v54  ;;  %v4443_v4 = vcombine.low %v1534_v38, %v1542_v54  ;;  %v1528_v38 = vld [vmem:[%s6173_s7 + $0xe0] sm:$0xff]  ;;  %v1521_v54 = vld [vmem:[%s6173_s7 + $0xa8] sm:$0xff] }
 0x61e   : > { %2400 = vmatpush1.bf16.msra.mxu0 %v4457_v37  ;;  %v4430_v37 = vcombine.high %v1519_v29, %v1527_v32 }
 0x61f   : > { %2401 = vmatprep.subr.bf16.mxu0 %v4474_v47  ;;  %v1551_v47 = vld [vmem:[%s6173_s7 + $0x198] sm:$0xff] }
 0x622   : > { %2402 = vmatpush1.bf16.msra.mxu0 %v4473_v46  ;;  %v1558_v46 = vld [vmem:[%s6173_s7 + $0x1d0] sm:$0xff] }
 0x623   : > { %v4460_v50 = vcombine.high %v1550_v44, %v1558_v46 }
 0x6e4   : > { %v1470_v56 = vpop.f32.mrb[12].mxu0 }
 0x6e5   : > { %v1471_v57 = vadd.f32 %v1470_v56, %v1387_v55  ;;  %v4968_v58 = vpop.f32.mrb[13].mxu0  ;;  %v4489_v55 = vcombine.low %v1581_v49, %v1589_v52  ;;  %v4490_v56 = vcombine.high %v1581_v49, %v1589_v52  ;;  %v4462_v52 = vcombine.high %v1551_v47, %v1559_v48 }
 0x6e6   : > { %v1473_v59 = vpop.f32.mrb[14].mxu0  ;;  %v1604_v58 = vld [vmem:[%s6173_s7 + $0x340] sm:$0xff] }
 0x6e7   : > { %v4969_v60 = vpop.f32.mrb[15].mxu0  ;;  %v1476_v62 = vadd.f32 %v5305_v61, %v1471_v57  ;;  %2403 = vmatprep.subr.bf16.mxu0 %v4490_v56  ;;  %v1596_v57 = vld [vmem:[%s6173_s7 + $0x300] sm:$0xff]  ;;  %v1597_v59 = vld [vmem:[%s6173_s7 + $0x308] sm:$0xff]  ;;  %v1567_v56 = vld [vmem:[%s6173_s7 + $0x218] sm:$0xff] }
 0x6e8   : > { %2404 = vmatpush1.bf16.msra.mxu0 %v4489_v55  ;;  %v4504_v60 = vcombine.high %v1596_v57, %v1604_v58  ;;  %v1605_v61 = vld [vmem:[%s6173_s7 + $0x348] sm:$0xff]  ;;  %v1574_v55 = vld [vmem:[%s6173_s7 + $0x250] sm:$0xff] }
 0x6e9   : > { %1477 = vadd.xlane.f32.xlu0 %v1476_v62  ;;  %v4505_v63 = vcombine.low %v1597_v59, %v1605_v61  ;;  %v4506_v0 = vcombine.high %v1597_v59, %v1605_v61  ;;  %v4461_v59 = vcombine.low %v1551_v47, %v1559_v48  ;;  %v4475_v2 = vcombine.low %v1566_v53, %v1574_v55  ;;  %v1545_v47 = vld [vmem:[%s6173_s7 + $0x168] sm:$0xff] }
 0x6ea   : > { %2364 = vmatprep.subr.bf16.mxu1 %v4504_v60  ;;  %v4476_v60 = vcombine.high %v1566_v53, %v1574_v55  ;;  %v1560_v53 = vld [vmem:[%s6173_s7 + $0x1e0] sm:$0xff]  ;;  %v1553_v55 = vld [vmem:[%s6173_s7 + $0x1a8] sm:$0xff] }
 0x6eb   : > { %2405 = vmatprep.subr.bf16.mxu0 %v4506_v0  ;;  %v1583_v0 = vld [vmem:[%s6173_s7 + $0x298] sm:$0xff] }
 0x6ec   : > { %2406 = vmatpush1.bf16.msra.mxu0 %v4505_v63  ;;  %v1590_v63 = vld [vmem:[%s6173_s7 + $0x2d0] sm:$0xff]  ;;  %v4494_v7 = vcombine.high %v1583_v0, %v1591_v1  ;;  %v4493_v12 = vcombine.low %v1583_v0, %v1591_v1  ;;  %v1577_v0 = vld [vmem:[%s6173_s7 + $0x268] sm:$0xff] }
 0x6ed   : > { %2407 = vmatprep.subr.bf16.mxu0 %v4522_v51  ;;  %v1599_v51 = vld [vmem:[%s6173_s7 + $0x318] sm:$0xff] }
 0x6f0   : > { %2408 = vmatpush1.bf16.msra.mxu0 %v4521_v9  ;;  %v1606_v9 = vld [vmem:[%s6173_s7 + $0x350] sm:$0xff] }
 0x6f1   : > { %2475 = vmatprep.subr.bf16.mxu0 %v4414_v17  ;;  %v1615_v17 = vld [vmem:[%s6173_s7 + $0x398] sm:$0xff] }
 0x776   : > { %v1478_v24 = vpop.xlane.xlu0 %1477 }
 0x777   : > { %v1480_v25 = vmul.f32 0.0078125, %v1478_v24 }
 0x779   : > { %v6356_v26 = vsub.f32 %v1476_v62, %v1480_v25  ;;  %v4503_v62 = vcombine.low %v1596_v57, %v1604_v58  ;;  %v1575_v57 = vld [vmem:[%s6173_s7 + $0x258] sm:$0xff]  ;;  %v4459_v58 = vcombine.low %v1550_v44, %v1558_v46  ;;  %v1544_v44 = vld [vmem:[%s6173_s7 + $0x160] sm:$0xff]  ;;  %v1537_v46 = vld [vmem:[%s6173_s7 + $0x128] sm:$0xff] }
 0x77a   : > { %v4478_v61 = vcombine.high %v1567_v56, %v1575_v57  ;;  %v4477_v5 = vcombine.low %v1567_v56, %v1575_v57  ;;  %v1561_v56 = vld [vmem:[%s6173_s7 + $0x1e8] sm:$0xff] }
 0x77b   : > { %v1482_v27 = vmul.f32 %v6356_v26, %v6356_v26  ;;  %2365 = vmatpush1.bf16.msra.mxu1 %v4503_v62  ;;  %v1582_v62 = vld [vmem:[%s6173_s7 + $0x290] sm:$0xff] }
 0x77c   : > { %2366 = vmatprep.subr.bf16.mxu1 %v4520_v6  ;;  %v4492_v6 = vcombine.high %v1582_v62, %v1590_v63  ;;  %v4491_v11 = vcombine.low %v1582_v62, %v1590_v63  ;;  %v1576_v62 = vld [vmem:[%s6173_s7 + $0x260] sm:$0xff]  ;;  %v1569_v63 = vld [vmem:[%s6173_s7 + $0x228] sm:$0xff] }
 0x77d   : > { %1483 = vadd.xlane.f32.xlu1 %v1482_v27  ;;  %v1518_v27 = vld [vmem:[%s6173_s7 + $0x90] sm:$0xff] }
 0x77e   : > { %v4428_v36 = vcombine.high %v1518_v27, %v1526_v28  ;;  %v4427_v40 = vcombine.low %v1518_v27, %v1526_v28  ;;  %v1513_v27 = vld [vmem:[%s6173_s7 + $0x68] sm:$0xff] }
 0x77f   : > { %2367 = vmatpush1.bf16.msra.mxu1 %v4519_v8  ;;  %v1598_v8 = vld [vmem:[%s6173_s7 + $0x310] sm:$0xff] }
 0x780   : > { %2434 = vmatprep.subr.bf16.mxu1 %v4412_v14  ;;  %v4510_v14 = vcombine.high %v1599_v51, %v1607_v10 }
 0x80a   : > { %v1484_v18 = vpop.xlane.xlu1 %1483 }
 0x80b   : > { %v1485_v19 = vmul.f32 0.0078125, %v1484_v18  ;;  %v1623_v18 = vld [vmem:[%s6173_s7 + $0x3d8] sm:$0xff] }
 0x80c   : > { %v4525_v29 = vcombine.low %v1615_v17, %v1623_v18 }
 0x80d   : > { %v1486_v20 = vadd.f32 1e-05, %v1485_v19  ;;  %v4507_v19 = vcombine.low %v1598_v8, %v1606_v9 }
 0x80f   : > { %5301 = vrsqrt.f32 %v1486_v20  ;;  %v4509_v20 = vcombine.low %v1599_v51, %v1607_v10  ;;  %v1593_v51 = vld [vmem:[%s6173_s7 + $0x2e8] sm:$0xff] }
 0x819   : > { %v5302_v22 = vpop.eup %5301 }
 0x81a   : > { %v1488_v24 = vmul.f32 %v5302_v22, %v6356_v26  ;;  %v1535_v26 = vld [vmem:[%s6173_s7 + $0x118] sm:$0xff]  ;;  %v4526_v22 = vcombine.high %v1615_v17, %v1623_v18  ;;  %v1609_v17 = vld [vmem:[%s6173_s7 + $0x368] sm:$0xff] }
 0x81b   : > { %v4446_v43 = vcombine.high %v1535_v26, %v1543_v39  ;;  %v4445_v49 = vcombine.low %v1535_v26, %v1543_v39  ;;  %v1529_v26 = vld [vmem:[%s6173_s7 + $0xe8] sm:$0xff] }
 0x81c   : > { %v1493_v25 = vmul.f32 %v1492_v21, %v1488_v24  ;;  %v1512_v24 = vld [vmem:[%s6173_s7 + $0x60] sm:$0xff] }
 0x81e   : > { %v6393_v34 = vadd.f32 %v1497_v23, %v1493_v25  ;;  %v1504_v23 = vld [vmem:[%s6173_s7 + $0x20] sm:$0xff]  ;;  %v1505_v25 = vld [vmem:[%s6173_s7 + $0x28] sm:$0xff] }
 0x81f   : > { %v4416_v32 = vcombine.high %v1504_v23, %v1512_v24  ;;  %v4415_v39 = vcombine.low %v1504_v23, %v1512_v24  ;;  %v1624_v23 = vld [vmem:[%s6173_s7 + $0x3e0] sm:$0xff]  ;;  %v1617_v24 = vld [vmem:[%s6173_s7 + $0x3a8] sm:$0xff] }
 0x820   : > { %v6397_v35 = vpack.c.bf16 %v6393_v34, %v6393_v34 }
 0x822   : > { %2385 = vmatmul.mubr.bf16.vlgmr.msra.gmra.mrb[28].mxu1 %v6397_v35  ;;  %2426 = vmatmul.mubr.bf16.vlgmr.msra.gmra.mrb[16].mxu0 %v6397_v35 }
 0x823   : > { %2435 = vmatpush1.bf16.msra.mxu1 %v4411_v13  ;;  %2476 = vmatpush1.bf16.msra.mxu0 %v4413_v16  ;;  %v4508_v13 = vcombine.high %v1598_v8, %v1606_v9  ;;  %v1622_v16 = vld [vmem:[%s6173_s7 + $0x3d0] sm:$0xff]  ;;  %v1592_v8 = vld [vmem:[%s6173_s7 + $0x2e0] sm:$0xff]  ;;  %v1585_v9 = vld [vmem:[%s6173_s7 + $0x2a8] sm:$0xff] }
 0x824   : > { %2436 = vmatprep.subr.bf16.mxu1 %v4428_v36  ;;  %2477 = vmatprep.subr.bf16.mxu0 %v4430_v37  ;;  %v4524_v21 = vcombine.high %v1614_v15, %v1622_v16  ;;  %v4523_v28 = vcombine.low %v1614_v15, %v1622_v16  ;;  %v4418_v36 = vcombine.high %v1505_v25, %v1513_v27  ;;  %v1520_v37 = vld [vmem:[%s6173_s7 + $0xa0] sm:$0xff]  ;;  %v1601_v16 = vld [vmem:[%s6173_s7 + $0x328] sm:$0xff] }
 0x825   : > { %2466 = vmatprep.mubr.bf16.mxu1 %v5669_v3  ;;  %2507 = vmatprep.mubr.bf16.mxu0 %v5669_v3  ;;  %v4431_v48 = vcombine.low %v1520_v37, %v1528_v38  ;;  %v1608_v15 = vld [vmem:[%s6173_s7 + $0x360] sm:$0xff] }
 0x827   : > { %2437 = vmatpush1.bf16.msra.mxu1 %v4427_v40  ;;  %2478 = vmatpush1.bf16.msra.mxu0 %v4429_v41  ;;  %v4417_v40 = vcombine.low %v1505_v25, %v1513_v27  ;;  %v4432_v41 = vcombine.high %v1520_v37, %v1528_v38  ;;  %v1625_v25 = vld [vmem:[%s6173_s7 + $0x3e8] sm:$0xff]  ;;  %v1514_v37 = vld [vmem:[%s6173_s7 + $0x70] sm:$0xff]  ;;  %v1507_v38 = vld [vmem:[%s6173_s7 + $0x38] sm:$0xff] }
 0x828   : > { %2438 = vmatprep.subr.bf16.mxu1 %v4444_v42  ;;  %2479 = vmatprep.subr.bf16.mxu0 %v4446_v43  ;;  %v4434_v42 = vcombine.high %v1521_v54, %v1529_v26  ;;  %v1536_v43 = vld [vmem:[%s6173_s7 + $0x120] sm:$0xff] }
 0x829   : > { %v4447_v57 = vcombine.low %v1536_v43, %v1544_v44 }
 0x82b   : > { %2439 = vmatpush1.bf16.msra.mxu1 %v4443_v4  ;;  %2480 = vmatpush1.bf16.msra.mxu0 %v4445_v49  ;;  %v4433_v4 = vcombine.low %v1521_v54, %v1529_v26  ;;  %v4448_v49 = vcombine.high %v1536_v43, %v1544_v44  ;;  %v1515_v54 = vld [vmem:[%s6173_s7 + $0x78] sm:$0xff]  ;;  %v1530_v43 = vld [vmem:[%s6173_s7 + $0xf0] sm:$0xff] }
 0x82c   : > { %2440 = vmatprep.subr.bf16.mxu1 %v4460_v50  ;;  %2481 = vmatprep.subr.bf16.mxu0 %v4462_v52  ;;  %v4450_v50 = vcombine.high %v1537_v46, %v1545_v47  ;;  %v1552_v52 = vld [vmem:[%s6173_s7 + $0x1a0] sm:$0xff]  ;;  %v1523_v44 = vld [vmem:[%s6173_s7 + $0xb8] sm:$0xff] }
 0x82d   : > { %v4463_v1 = vcombine.low %v1552_v52, %v1560_v53 }
 0x82f   : > { %2441 = vmatpush1.bf16.msra.mxu1 %v4459_v58  ;;  %2482 = vmatpush1.bf16.msra.mxu0 %v4461_v59  ;;  %v4449_v58 = vcombine.low %v1537_v46, %v1545_v47  ;;  %v4464_v59 = vcombine.high %v1552_v52, %v1560_v53  ;;  %v1531_v46 = vld [vmem:[%s6173_s7 + $0xf8] sm:$0xff]  ;;  %v1546_v52 = vld [vmem:[%s6173_s7 + $0x170] sm:$0xff] }
 0x830   : > { %2442 = vmatprep.subr.bf16.mxu1 %v4476_v60  ;;  %2483 = vmatprep.subr.bf16.mxu0 %v4478_v61  ;;  %v4466_v60 = vcombine.high %v1553_v55, %v1561_v56  ;;  %v1568_v61 = vld [vmem:[%s6173_s7 + $0x220] sm:$0xff]  ;;  %v1539_v53 = vld [vmem:[%s6173_s7 + $0x138] sm:$0xff] }
 0x831   : > { %v4479_v10 = vcombine.low %v1568_v61, %v1576_v62 }
 0x833   : > { %2443 = vmatpush1.bf16.msra.mxu1 %v4475_v2  ;;  %2484 = vmatpush1.bf16.msra.mxu0 %v4477_v5  ;;  %v4465_v2 = vcombine.low %v1553_v55, %v1561_v56  ;;  %v4480_v5 = vcombine.high %v1568_v61, %v1576_v62  ;;  %v1547_v55 = vld [vmem:[%s6173_s7 + $0x178] sm:$0xff]  ;;  %v1562_v61 = vld [vmem:[%s6173_s7 + $0x1f0] sm:$0xff] }
 0x834   : > { %2444 = vmatprep.subr.bf16.mxu1 %v4492_v6  ;;  %2485 = vmatprep.subr.bf16.mxu0 %v4494_v7  ;;  %v4482_v6 = vcombine.high %v1569_v63, %v1577_v0  ;;  %v1584_v7 = vld [vmem:[%s6173_s7 + $0x2a0] sm:$0xff]  ;;  %v1555_v62 = vld [vmem:[%s6173_s7 + $0x1b8] sm:$0xff] }
 0x835   : > { %v4495_v18 = vcombine.low %v1584_v7, %v1592_v8 }
 0x837   : > { %2445 = vmatpush1.bf16.msra.mxu1 %v4491_v11  ;;  %2486 = vmatpush1.bf16.msra.mxu0 %v4493_v12  ;;  %v4481_v11 = vcombine.low %v1569_v63, %v1577_v0  ;;  %v4496_v12 = vcombine.high %v1584_v7, %v1592_v8  ;;  %v1563_v63 = vld [vmem:[%s6173_s7 + $0x1f8] sm:$0xff]  ;;  %v1578_v7 = vld [vmem:[%s6173_s7 + $0x270] sm:$0xff] }
 0x838   : > { %2446 = vmatprep.subr.bf16.mxu1 %v4508_v13  ;;  %2487 = vmatprep.subr.bf16.mxu0 %v4510_v14  ;;  %v4498_v13 = vcombine.high %v1585_v9, %v1593_v51  ;;  %v1600_v14 = vld [vmem:[%s6173_s7 + $0x320] sm:$0xff]  ;;  %v1571_v8 = vld [vmem:[%s6173_s7 + $0x238] sm:$0xff] }
 0x839   : > { %v4511_v27 = vcombine.low %v1600_v14, %v1608_v15 }
 0x83b   : > { %2447 = vmatpush1.bf16.msra.mxu1 %v4507_v19  ;;  %2488 = vmatpush1.bf16.msra.mxu0 %v4509_v20  ;;  %v4497_v19 = vcombine.low %v1585_v9, %v1593_v51  ;;  %v4512_v20 = vcombine.high %v1600_v14, %v1608_v15  ;;  %v1579_v9 = vld [vmem:[%s6173_s7 + $0x278] sm:$0xff] }
 0x83c   : > { %2448 = vmatprep.subr.bf16.mxu1 %v4524_v21  ;;  %2489 = vmatprep.subr.bf16.mxu0 %v4526_v22  ;;  %v4514_v21 = vcombine.high %v1601_v16, %v1609_v17  ;;  %v1616_v22 = vld [vmem:[%s6173_s7 + $0x3a0] sm:$0xff]  ;;  %v1587_v14 = vld [vmem:[%s6173_s7 + $0x2b8] sm:$0xff] }
 0x83d   : > { %v4527_v26 = vcombine.low %v1616_v22, %v1624_v23  ;;  %v1595_v15 = vld [vmem:[%s6173_s7 + $0x2f8] sm:$0xff] }
 0x83f   : > { %2449 = vmatpush1.bf16.msra.mxu1 %v4523_v28  ;;  %2490 = vmatpush1.bf16.msra.mxu0 %v4525_v29  ;;  %v4513_v28 = vcombine.low %v1601_v16, %v1609_v17  ;;  %v4528_v29 = vcombine.high %v1616_v22, %v1624_v23  ;;  %v4485_v17 = vcombine.low %v1571_v8, %v1579_v9  ;;  %v1603_v22 = vld [vmem:[%s6173_s7 + $0x338] sm:$0xff] }
 0x840   : > { %2516 = vmatprep.subr.bf16.mxu1 %v4416_v32  ;;  %2557 = vmatprep.subr.bf16.mxu0 %v4418_v36  ;;  %v4530_v32 = vcombine.high %v1617_v24, %v1625_v25  ;;  %v1506_v36 = vld [vmem:[%s6173_s7 + $0x30] sm:$0xff]  ;;  %v1611_v23 = vld [vmem:[%s6173_s7 + $0x378] sm:$0xff] }
 0x841   : > { %v4419_v47 = vcombine.low %v1506_v36, %v1514_v37 }
 0x842   : > { %2467 = vmatmul.mubr.bf16.vlgmr.msra.gmra.mrb[32].mxu1 %v6397_v35  ;;  %2508 = vmatmul.mubr.bf16.vlgmr.msra.gmra.mrb[20].mxu0 %v6397_v35 }
 0x843   : > { %2517 = vmatpush1.bf16.msra.mxu1 %v4415_v39  ;;  %2558 = vmatpush1.bf16.msra.mxu0 %v4417_v40  ;;  %v4529_v39 = vcombine.low %v1617_v24, %v1625_v25  ;;  %v4420_v40 = vcombine.high %v1506_v36, %v1514_v37  ;;  %v4501_v25 = vcombine.low %v1587_v14, %v1595_v15  ;;  %v1619_v36 = vld [vmem:[%s6173_s7 + $0x3b8] sm:$0xff] }
 0x844   : > { %2518 = vmatprep.subr.bf16.mxu1 %v4432_v41  ;;  %2559 = vmatprep.subr.bf16.mxu0 %v4434_v42  ;;  %v4422_v41 = vcombine.high %v1507_v38, %v1515_v54  ;;  %v1522_v42 = vld [vmem:[%s6173_s7 + $0xb0] sm:$0xff]  ;;  %v1627_v37 = vld [vmem:[%s6173_s7 + $0x3f8] sm:$0xff] }
 0x845   : > { %2548 = vmatprep.mubr.bf16.mxu1 %v5669_v3  ;;  %2589 = vmatprep.mubr.bf16.mxu0 %v5669_v3  ;;  %v4435_v56 = vcombine.low %v1522_v42, %v1530_v43 }
 0x847   : > { %2519 = vmatpush1.bf16.msra.mxu1 %v4431_v48  ;;  %2560 = vmatpush1.bf16.msra.mxu0 %v4433_v4  ;;  %v4421_v48 = vcombine.low %v1507_v38, %v1515_v54  ;;  %v4436_v4 = vcombine.high %v1522_v42, %v1530_v43  ;;  %v4517_v54 = vcombine.low %v1603_v22, %v1611_v23  ;;  %v5157_v42 = vld [vmem:[%s6175_s29 + $0x40] sm:$0xff]  }
 0x848   : > { %2520 = vmatprep.subr.bf16.mxu1 %v4448_v49  ;;  %2561 = vmatprep.subr.bf16.mxu0 %v4450_v50  ;;  %v4438_v49 = vcombine.high %v1523_v44, %v1531_v46  ;;  %v1538_v50 = vld [vmem:[%s6173_s7 + $0x130] sm:$0xff]  ;;  %v5158_v43 = vld [vmem:[%s6175_s29 + $0xc0] sm:$0xff]  }
 0x849   : > { %v4451_v0 = vcombine.low %v1538_v50, %v1546_v52 }
 0x84b   : > { %2521 = vmatpush1.bf16.msra.mxu1 %v4447_v57  ;;  %2562 = vmatpush1.bf16.msra.mxu0 %v4449_v58  ;;  %v4437_v57 = vcombine.low %v1523_v44, %v1531_v46  ;;  %v4452_v58 = vcombine.high %v1538_v50, %v1546_v52  ;;  %v5159_v44 = vld [vmem:[%s6175_s29] sm:$0xff]   ;;  %v5165_v50 = vld [vmem:[%s6175_s29 + $0x50] sm:$0xff]  }
 0x84c   : > { %2522 = vmatprep.subr.bf16.mxu1 %v4464_v59  ;;  %2563 = vmatprep.subr.bf16.mxu0 %v4466_v60  ;;  %v4454_v59 = vcombine.high %v1539_v53, %v1547_v55  ;;  %v1554_v60 = vld [vmem:[%s6173_s7 + $0x1b0] sm:$0xff]  ;;  %v5160_v46 = vld [vmem:[%s6175_s29 + $0x80] sm:$0xff]  }
 0x84d   : > { %v4467_v51 = vcombine.low %v1554_v60, %v1562_v61  ;;  %v5166_v52 = vld [vmem:[%s6175_s29 + $0xd0] sm:$0xff]  }
 0x84f   : > { %2523 = vmatpush1.bf16.msra.mxu1 %v4463_v1  ;;  %2564 = vmatpush1.bf16.msra.mxu0 %v4465_v2  ;;  %v4453_v1 = vcombine.low %v1539_v53, %v1547_v55  ;;  %v4468_v2 = vcombine.high %v1554_v60, %v1562_v61  ;;  %v5167_v53 = vld [vmem:[%s6175_s29 + $0x10] sm:$0xff]   ;;  %v5174_v60 = vld [vmem:[%s6175_s29 + $0xe0] sm:$0xff]  }
 0x850   : > { %2524 = vmatprep.subr.bf16.mxu1 %v4480_v5  ;;  %2565 = vmatprep.subr.bf16.mxu0 %v4482_v6  ;;  %v4470_v5 = vcombine.high %v1555_v62, %v1563_v63  ;;  %v1570_v6 = vld [vmem:[%s6173_s7 + $0x230] sm:$0xff]  ;;  %v5175_v61 = vld [vmem:[%s6175_s29 + $0x20] sm:$0xff]  }
 0x851   : > { %v4483_v16 = vcombine.low %v1570_v6, %v1578_v7  ;;  %v5168_v55 = vld [vmem:[%s6175_s29 + $0x90] sm:$0xff]  }
 0x853   : > { %2525 = vmatpush1.bf16.msra.mxu1 %v4479_v10  ;;  %2566 = vmatpush1.bf16.msra.mxu0 %v4481_v11  ;;  %v4484_v10 = vcombine.high %v1570_v6, %v1578_v7  ;;  %v4486_v11 = vcombine.high %v1571_v8, %v1579_v9  ;;  %v5182_v6 = vld [vmem:[%s6175_s29 + $0xf0] sm:$0xff]   ;;  %v5185_v9 = vld [vmem:[%s6175_s29 + $0x78] sm:$0xff]  }
 0x854   : > { %2526 = vmatprep.subr.bf16.mxu1 %v4496_v12  ;;  %2567 = vmatprep.subr.bf16.mxu0 %v4498_v13  ;;  %v1586_v12 = vld [vmem:[%s6173_s7 + $0x2b0] sm:$0xff] }
 0x855   : > { %v1594_v13 = vld [vmem:[%s6173_s7 + $0x2f0] sm:$0xff] }
 0x856   : > { %v4499_v24 = vcombine.low %v1586_v12, %v1594_v13  ;;  %v5183_v7 = vld [vmem:[%s6175_s29 + $0x30] sm:$0xff]  }
 0x857   : > { %2527 = vmatpush1.bf16.msra.mxu1 %v4495_v18  ;;  %2568 = vmatpush1.bf16.msra.mxu0 %v4497_v19  ;;  %v4500_v18 = vcombine.high %v1586_v12, %v1594_v13  ;;  %v4502_v19 = vcombine.high %v1587_v14, %v1595_v15  ;;  %v5184_v8 = vld [vmem:[%s6175_s29 + $0xb0] sm:$0xff]   ;;  %v5190_v12 = vld [vmem:[%s6175_s29 + $0x1c0] sm:$0xff]   ;;  %v6539_v14 = vsub.s32 3, %v6240_v30 }
 0x858   : > { %2528 = vmatprep.subr.bf16.mxu1 %v4512_v20  ;;  %2569 = vmatprep.subr.bf16.mxu0 %v4514_v21  ;;  %v1602_v20 = vld [vmem:[%s6173_s7 + $0x330] sm:$0xff] }
 0x859   : > { %v1610_v21 = vld [vmem:[%s6173_s7 + $0x370] sm:$0xff] }
 0x85a   : > { %v4515_v38 = vcombine.low %v1602_v20, %v1610_v21  ;;  %v6536_v13 = vld [vmem:[%s6193_s5] sm:$0xff] }
 0x85b   : > { %2529 = vmatpush1.bf16.msra.mxu1 %v4511_v27  ;;  %2570 = vmatpush1.bf16.msra.mxu0 %v4513_v28  ;;  %v4516_v27 = vcombine.high %v1602_v20, %v1610_v21  ;;  %v4518_v28 = vcombine.high %v1603_v22, %v1611_v23  ;;  %v1635_v15 = vrot.slane %v6536_v13, %v6247_v33 }
 0x85c   : > { %2530 = vmatprep.subr.bf16.mxu1 %v4528_v29  ;;  %2571 = vmatprep.subr.bf16.mxu0 %v4530_v32  ;;  %v1618_v29 = vld [vmem:[%s6173_s7 + $0x3b0] sm:$0xff] }
 0x85d   : > { %v1626_v32 = vld [vmem:[%s6173_s7 + $0x3f0] sm:$0xff] }
 0x85f   : > { %2531 = vmatpush1.bf16.msra.mxu1 %v4527_v26  ;;  %2572 = vmatpush1.bf16.msra.mxu0 %v4529_v39  ;;  %v4532_v26 = vcombine.high %v1618_v29, %v1626_v32  ;;  %v4534_v39 = vcombine.high %v1619_v36, %v1627_v37 }
 0x860   : > { %2598 = vmatprep.subr.bf16.mxu1 %v4420_v40  ;;  %2639 = vmatprep.subr.bf16.mxu0 %v4422_v41  ;;  %v4531_v40 = vcombine.low %v1618_v29, %v1626_v32  ;;  %v4533_v41 = vcombine.low %v1619_v36, %v1627_v37 }
 0x862   : > { %2549 = vmatmul.mubr.bf16.vlgmr.msra.gmra.mrb[36].mxu1 %v6397_v35  ;;  %2590 = vmatmul.mubr.bf16.vlgmr.msra.gmra.mrb[24].mxu0 %v6397_v35 }
 0x863   : > { %2599 = vmatpush1.bf16.msra.mxu1 %v4419_v47  ;;  %2640 = vmatpush1.bf16.msra.mxu0 %v4421_v48  ;;  %v5161_v47 = vld [vmem:[%s6175_s29 + $0x48] sm:$0xff]  }
 0x864   : > { %2600 = vmatprep.subr.bf16.mxu1 %v4436_v4  ;;  %2641 = vmatprep.subr.bf16.mxu0 %v4438_v49  ;;  %v5162_v48 = vld [vmem:[%s6175_s29 + $0xc8] sm:$0xff]  }
 0x865   : > { %2630 = vmatprep.mubr.bf16.mxu1 %v5669_v3  ;;  %2671 = vmatprep.mubr.bf16.mxu0 %v5669_v3  ;;  %v4469_v3 = vcombine.low %v1555_v62, %v1563_v63  ;;  %v5163_v4 = vld [vmem:[%s6175_s29 + $0x8] sm:$0xff]   ;;  %v5176_v62 = vld [vmem:[%s6175_s29 + $0xa0] sm:$0xff]  }
 0x866   : > { %v5164_v49 = vld [vmem:[%s6175_s29 + $0x88] sm:$0xff]  }
 0x867   : > { %2601 = vmatpush1.bf16.msra.mxu1 %v4435_v56  ;;  %2642 = vmatpush1.bf16.msra.mxu0 %v4437_v57  ;;  %v5170_v56 = vld [vmem:[%s6175_s29 + $0xd8] sm:$0xff]   ;;  %v5177_v63 = vld [vmem:[%s6175_s29 + $0x68] sm:$0xff]  }
 0x868   : > { %2602 = vmatprep.subr.bf16.mxu1 %v4452_v58  ;;  %2643 = vmatprep.subr.bf16.mxu0 %v4454_v59  ;;  %v5171_v57 = vld [vmem:[%s6175_s29 + $0x18] sm:$0xff]   ;;  %v5173_v59 = vld [vmem:[%s6175_s29 + $0x60] sm:$0xff]  }
 0x869   : > { %v5172_v58 = vld [vmem:[%s6175_s29 + $0x98] sm:$0xff]  }
 0x86b   : > { %2603 = vmatpush1.bf16.msra.mxu1 %v4451_v0  ;;  %2644 = vmatpush1.bf16.msra.mxu0 %v4453_v1  ;;  %v5178_v0 = vld [vmem:[%s6175_s29 + $0xe8] sm:$0xff]  }
 0x86c   : > { %2604 = vmatprep.subr.bf16.mxu1 %v4468_v2  ;;  %2645 = vmatprep.subr.bf16.mxu0 %v4470_v5  ;;  %v5179_v1 = vld [vmem:[%s6175_s29 + $0x28] sm:$0xff]   ;;  %v5181_v5 = vld [vmem:[%s6175_s29 + $0x70] sm:$0xff]  }
 0x86d   : > { %v5180_v2 = vld [vmem:[%s6175_s29 + $0xa8] sm:$0xff]  }
 0x86f   : > { %2605 = vmatpush1.bf16.msra.mxu1 %v4467_v51  ;;  %2646 = vmatpush1.bf16.msra.mxu0 %v4469_v3  ;;  %v5186_v51 = vld [vmem:[%s6175_s29 + $0xf8] sm:$0xff]  }
 0x870   : > { %2606 = vmatprep.subr.bf16.mxu1 %v4484_v10  ;;  %2647 = vmatprep.subr.bf16.mxu0 %v4486_v11  ;;  %v5187_v3 = vld [vmem:[%s6175_s29 + $0x38] sm:$0xff]   ;;  %v5189_v11 = vld [vmem:[%s6175_s29 + $0x140] sm:$0xff]  }
 0x871   : > { %v5188_v10 = vld [vmem:[%s6175_s29 + $0xb8] sm:$0xff]  }
 0x873   : > { %2607 = vmatpush1.bf16.msra.mxu1 %v4483_v16  ;;  %2648 = vmatpush1.bf16.msra.mxu0 %v4485_v17  ;;  %v1643_v16 = vrot.slane %v6536_v13, %v6263_v45  ;;  %v1639_v17 = vrot.slane %v6536_v13, %v6243_v31 }
 0x874   : > { %2608 = vmatprep.subr.bf16.mxu1 %v4500_v18  ;;  %2649 = vmatprep.subr.bf16.mxu0 %v4502_v19  ;;  %v1647_v18 = vrot.slane %v6536_v13, %v6539_v14 }
 0x877   : > { %2609 = vmatpush1.bf16.msra.mxu1 %v4499_v24  ;;  %2650 = vmatpush1.bf16.msra.mxu0 %v4501_v25 }
 0x878   : > { %2610 = vmatprep.subr.bf16.mxu1 %v4516_v27  ;;  %2651 = vmatprep.subr.bf16.mxu0 %v4518_v28 }
 0x87b   : > { %2611 = vmatpush1.bf16.msra.mxu1 %v4515_v38  ;;  %2652 = vmatpush1.bf16.msra.mxu0 %v4517_v54 }
 0x87c   : > { %2612 = vmatprep.subr.bf16.mxu1 %v4532_v26  ;;  %2653 = vmatprep.subr.bf16.mxu0 %v4534_v39 }
 0x87f   : > { %2613 = vmatpush1.bf16.msra.mxu1 %v4531_v40  ;;  %2654 = vmatpush1.bf16.msra.mxu0 %v4533_v41  ;;  %v5191_v41 = vld [vmem:[%s6175_s29 + $0x100] sm:$0xff]  }
 0x880   : > { %4706 = vmatprep.subr.bf16.mxu1 %v5157_v42  ;;  %4728 = vmatprep.subr.bf16.mxu0 %v5158_v43  ;;  %v5192_v42 = vld [vmem:[%s6175_s29 + $0x180] sm:$0xff]  }
 0x882   : > { %2631 = vmatmul.mubr.bf16.vlgmr.msra.gmra.mrb[40].mxu1 %v6397_v35  ;;  %2672 = vmatmul.mubr.bf16.vlgmr.msra.gmra.mrb[28].mxu0 %v6397_v35  ;;  %v5169_v35 = vld [vmem:[%s6175_s29 + $0x58] sm:$0xff]  }
 0x883   : > { %4707 = vmatpush3.bf16.msra.mxu1 %v5159_v44  ;;  %4729 = vmatpush3.bf16.msra.mxu0 %v5160_v46  ;;  %v5193_v46 = vld [vmem:[%s6175_s29 + $0x148] sm:$0xff]  }
 0x884   : > { %4708 = vmatprep.subr.bf16.mxu1 %v5161_v47  ;;  %4730 = vmatprep.subr.bf16.mxu0 %v5162_v48  ;;  %v5194_v47 = vld [vmem:[%s6175_s29 + $0x1c8] sm:$0xff]  }
 0x885   : > { %v5195_v48 = vld [vmem:[%s6175_s29 + $0x108] sm:$0xff]  }
 0x887   : > { %4709 = vmatpush3.bf16.msra.mxu1 %v5163_v4  ;;  %4731 = vmatpush3.bf16.msra.mxu0 %v5164_v49  ;;  %v5196_v4 = vld [vmem:[%s6175_s29 + $0x188] sm:$0xff]   ;;  %v5197_v49 = vld [vmem:[%s6175_s29 + $0x150] sm:$0xff]  }
 0x888   : > { %4710 = vmatprep.subr.bf16.mxu1 %v5165_v50  ;;  %4732 = vmatprep.subr.bf16.mxu0 %v5166_v52  ;;  %v5198_v50 = vld [vmem:[%s6175_s29 + $0x1d0] sm:$0xff]  }
 0x889   : > { %v5199_v52 = vld [vmem:[%s6175_s29 + $0x110] sm:$0xff]  }
 0x88b   : > { %4711 = vmatpush3.bf16.msra.mxu1 %v5167_v53  ;;  %4733 = vmatpush3.bf16.msra.mxu0 %v5168_v55  ;;  %v5200_v53 = vld [vmem:[%s6175_s29 + $0x190] sm:$0xff]   ;;  %v5201_v55 = vld [vmem:[%s6175_s29 + $0x158] sm:$0xff]  }
 0x88c   : > { %4712 = vmatprep.subr.bf16.mxu1 %v5169_v35  ;;  %4734 = vmatprep.subr.bf16.mxu0 %v5170_v56  ;;  %v5202_v35 = vld [vmem:[%s6175_s29 + $0x1d8] sm:$0xff]  }
 0x88d   : > { %v5203_v56 = vld [vmem:[%s6175_s29 + $0x118] sm:$0xff]  }
 0x88f   : > { %4713 = vmatpush3.bf16.msra.mxu1 %v5171_v57  ;;  %4735 = vmatpush3.bf16.msra.mxu0 %v5172_v58  ;;  %v5204_v57 = vld [vmem:[%s6175_s29 + $0x198] sm:$0xff]   ;;  %v5205_v58 = vld [vmem:[%s6175_s29 + $0x160] sm:$0xff]  }
 0x890   : > { %4714 = vmatprep.subr.bf16.mxu1 %v5173_v59  ;;  %4736 = vmatprep.subr.bf16.mxu0 %v5174_v60  ;;  %v5206_v59 = vld [vmem:[%s6175_s29 + $0x1e0] sm:$0xff]  }
 0x891   : > { %v5207_v60 = vld [vmem:[%s6175_s29 + $0x120] sm:$0xff]  }
 0x893   : > { %4715 = vmatpush3.bf16.msra.mxu1 %v5175_v61  ;;  %4737 = vmatpush3.bf16.msra.mxu0 %v5176_v62  ;;  %v5208_v61 = vld [vmem:[%s6175_s29 + $0x1a0] sm:$0xff]   ;;  %v5209_v62 = vld [vmem:[%s6175_s29 + $0x168] sm:$0xff]  }
 0x894   : > { %4716 = vmatprep.subr.bf16.mxu1 %v5177_v63  ;;  %4738 = vmatprep.subr.bf16.mxu0 %v5178_v0  ;;  %v5210_v63 = vld [vmem:[%s6175_s29 + $0x1e8] sm:$0xff]   ;;  %v6570_v0 = vsub.s32 4, %v6240_v30 }
 0x897   : > { %4717 = vmatpush3.bf16.msra.mxu1 %v5179_v1  ;;  %4739 = vmatpush3.bf16.msra.mxu0 %v5180_v2  ;;  %v1658_v1 = vsub.s32 6, %v6240_v30  ;;  %v5211_v2 = vld [vmem:[%s6175_s29 + $0x128] sm:$0xff]  }
 0x898   : > { %4718 = vmatprep.subr.bf16.mxu1 %v5181_v5  ;;  %4740 = vmatprep.subr.bf16.mxu0 %v5182_v6  ;;  %v5212_v5 = vld [vmem:[%s6175_s29 + $0x1a8] sm:$0xff]   ;;  %v6576_v6 = vsub.s32 5, %v6240_v30 }
 0x89b   : > { %4719 = vmatpush3.bf16.msra.mxu1 %v5183_v7  ;;  %4741 = vmatpush3.bf16.msra.mxu0 %v5184_v8  ;;  %v1662_v7 = vsub.s32 7, %v6240_v30  ;;  %v5213_v8 = vld [vmem:[%s6175_s29 + $0x170] sm:$0xff]  }
 0x89c   : > { %4720 = vmatprep.subr.bf16.mxu1 %v5185_v9  ;;  %4742 = vmatprep.subr.bf16.mxu0 %v5186_v51  ;;  %v5214_v9 = vld [vmem:[%s6175_s29 + $0x1f0] sm:$0xff]   ;;  %v1651_v51 = vrot.slane %v6536_v13, %v6570_v0 }
 0x89f   : > { %4721 = vmatpush3.bf16.msra.mxu1 %v5187_v3  ;;  %4743 = vmatpush3.bf16.msra.mxu0 %v5188_v10  ;;  %v1659_v3 = vrot.slane %v6536_v13, %v1658_v1  ;;  %v1655_v10 = vrot.slane %v6536_v13, %v6576_v6 }
 0x8a0   : > { %4750 = vmatprep.subr.bf16.mxu1 %v5189_v11  ;;  %4772 = vmatprep.subr.bf16.mxu0 %v5190_v12  ;;  %v1663_v11 = vrot.slane %v6536_v13, %v1662_v7  ;;  %v5215_v12 = vld [vmem:[%s6175_s29 + $0x130] sm:$0xff]  }
 0x8f5   : > { %v2386_v19 = vpop.f32.mrb[28].mxu1  ;;  %v2427_v20 = vpop.f32.mrb[16].mxu0 }
 0x8f6   : > { %v2387_v21 = vadd.f32 %v2386_v19, %v1635_v15  ;;  %v2428_v22 = vadd.f32 %v2427_v20, %v1643_v16  ;;  %v2388_v23 = vpop.f32.mrb[29].mxu1  ;;  %v2429_v24 = vpop.f32.mrb[17].mxu0  ;;  %v5216_v15 = vld [vmem:[%s6175_s29 + $0x1b0] sm:$0xff]   ;;  %v5217_v16 = vld [vmem:[%s6175_s29 + $0x178] sm:$0xff]  }
 0x8f7   : > { %v2389_v25 = vadd.f32 %v2388_v23, %v1639_v17  ;;  %v2430_v27 = vadd.f32 %v2429_v24, %v1647_v18  ;;  %v2390_v28 = vpop.f32.mrb[30].mxu1  ;;  %v2431_v29 = vpop.f32.mrb[18].mxu0  ;;  %v5218_v17 = vld [vmem:[%s6175_s29 + $0x1f8] sm:$0xff]  }
 0x8f8   : > { %v2680_v32 = vmax.f32 %v2387_v21, 0.0  ;;  %v2682_v36 = vmax.f32 %v2428_v22, 0.0  ;;  %v2391_v37 = vpop.f32.mrb[31].mxu1  ;;  %v2432_v38 = vpop.f32.mrb[19].mxu0  ;;  %v5219_v28 = vld [vmem:[%s6175_s29 + $0x138] sm:$0xff]  }
 0x8f9   : > { %v2681_v54 = vmax.f32 %v2389_v25, 0.0  ;;  %v2683_v26 = vmax.f32 %v2430_v27, 0.0  ;;  %v5220_v29 = vld [vmem:[%s6175_s29 + $0x1b8] sm:$0xff]  }
 0x8fa   : > { %v2696_v43 = vpack.c.bf16 %v2680_v32, %v2680_v32  ;;  %v2698_v44 = vpack.c.bf16 %v2682_v36, %v2682_v36 }
 0x8fb   : > { %v2697_v39 = vpack.c.bf16 %v2681_v54, %v2681_v54  ;;  %v2699_v40 = vpack.c.bf16 %v2683_v26, %v2683_v26  ;;  %v5221_v54 = vld [vmem:[%s6175_s29 + $0x240] sm:$0xff]  }
 0x8fc   : > { %v5222_v26 = vld [vmem:[%s6175_s29 + $0x2c0] sm:$0xff]  }
 0x8fd   : > { %3772 = vmatprep.mubr.bf16.mxu1 %v2697_v39  ;;  %3812 = vmatprep.mubr.bf16.mxu0 %v2699_v40 }
 0x8fe   : > { %3773 = vmatmul.mubr.bf16.vlgmr.msra.gmra.mrb[44].mxu1 %v2696_v43  ;;  %3813 = vmatmul.mubr.bf16.vlgmr.msra.gmra.mrb[32].mxu0 %v2698_v44  ;;  %v5223_v43 = vld [vmem:[%s6175_s29 + $0x200] sm:$0xff]  }
 0x8ff   : > { %4751 = vmatpush3.bf16.msra.mxu1 %v5191_v41  ;;  %4773 = vmatpush3.bf16.msra.mxu0 %v5192_v42  ;;  %v5224_v44 = vld [vmem:[%s6175_s29 + $0x280] sm:$0xff]  }
 0x900   : > { %4752 = vmatprep.subr.bf16.mxu1 %v5193_v46  ;;  %4774 = vmatprep.subr.bf16.mxu0 %v5194_v47 }
 0x903   : > { %4753 = vmatpush3.bf16.msra.mxu1 %v5195_v48  ;;  %4775 = vmatpush3.bf16.msra.mxu0 %v5196_v4  ;;  %v5225_v48 = vld [vmem:[%s6175_s29 + $0x248] sm:$0xff]  }
 0x904   : > { %4754 = vmatprep.subr.bf16.mxu1 %v5197_v49  ;;  %4776 = vmatprep.subr.bf16.mxu0 %v5198_v50  ;;  %v5226_v4 = vld [vmem:[%s6175_s29 + $0x2c8] sm:$0xff]  }
 0x905   : > { %v5227_v49 = vld [vmem:[%s6175_s29 + $0x208] sm:$0xff]  }
 0x906   : > { %v5228_v50 = vld [vmem:[%s6175_s29 + $0x288] sm:$0xff]  }
 0x907   : > { %4755 = vmatpush3.bf16.msra.mxu1 %v5199_v52  ;;  %4777 = vmatpush3.bf16.msra.mxu0 %v5200_v53  ;;  %v5229_v52 = vld [vmem:[%s6175_s29 + $0x250] sm:$0xff]  }
 0x908   : > { %4756 = vmatprep.subr.bf16.mxu1 %v5201_v55  ;;  %4778 = vmatprep.subr.bf16.mxu0 %v5202_v35  ;;  %v5230_v53 = vld [vmem:[%s6175_s29 + $0x2d0] sm:$0xff]  }
 0x909   : > { %v5231_v55 = vld [vmem:[%s6175_s29 + $0x210] sm:$0xff]  }
 0x90a   : > { %v5232_v35 = vld [vmem:[%s6175_s29 + $0x290] sm:$0xff]  }
 0x90b   : > { %4757 = vmatpush3.bf16.msra.mxu1 %v5203_v56  ;;  %4779 = vmatpush3.bf16.msra.mxu0 %v5204_v57  ;;  %v5233_v56 = vld [vmem:[%s6175_s29 + $0x258] sm:$0xff]  }
 0x90c   : > { %4758 = vmatprep.subr.bf16.mxu1 %v5205_v58  ;;  %4780 = vmatprep.subr.bf16.mxu0 %v5206_v59  ;;  %v5234_v57 = vld [vmem:[%s6175_s29 + $0x2d8] sm:$0xff]  }
 0x90d   : > { %v5235_v58 = vld [vmem:[%s6175_s29 + $0x218] sm:$0xff]  }
 0x90e   : > { %v5236_v59 = vld [vmem:[%s6175_s29 + $0x298] sm:$0xff]  }
 0x90f   : > { %4759 = vmatpush3.bf16.msra.mxu1 %v5207_v60  ;;  %4781 = vmatpush3.bf16.msra.mxu0 %v5208_v61  ;;  %v5237_v60 = vld [vmem:[%s6175_s29 + $0x260] sm:$0xff]  }
 0x910   : > { %4760 = vmatprep.subr.bf16.mxu1 %v5209_v62  ;;  %4782 = vmatprep.subr.bf16.mxu0 %v5210_v63  ;;  %v5238_v61 = vld [vmem:[%s6175_s29 + $0x2e0] sm:$0xff]  }
 0x911   : > { %v5239_v62 = vld [vmem:[%s6175_s29 + $0x220] sm:$0xff]  }
 0x912   : > { %v5240_v63 = vld [vmem:[%s6175_s29 + $0x2a0] sm:$0xff]  }
 0x913   : > { %4761 = vmatpush3.bf16.msra.mxu1 %v5211_v2  ;;  %4783 = vmatpush3.bf16.msra.mxu0 %v5212_v5  ;;  %v5241_v2 = vld [vmem:[%s6175_s29 + $0x268] sm:$0xff]  }
 0x914   : > { %4762 = vmatprep.subr.bf16.mxu1 %v5213_v8  ;;  %4784 = vmatprep.subr.bf16.mxu0 %v5214_v9  ;;  %v5242_v5 = vld [vmem:[%s6175_s29 + $0x2e8] sm:$0xff]  }
 0x915   : > { %v2468_v18 = vpop.f32.mrb[32].mxu1  ;;  %v2509_v19 = vpop.f32.mrb[20].mxu0  ;;  %v5243_v8 = vld [vmem:[%s6175_s29 + $0x228] sm:$0xff]  }
 0x916   : > { %v2469_v20 = vadd.f32 %v2468_v18, %v1651_v51  ;;  %v2510_v21 = vadd.f32 %v2509_v19, %v1659_v3  ;;  %v2470_v22 = vpop.f32.mrb[33].mxu1  ;;  %v2511_v23 = vpop.f32.mrb[21].mxu0  ;;  %v5244_v9 = vld [vmem:[%s6175_s29 + $0x2a8] sm:$0xff]   ;;  %v5245_v3 = vld [vmem:[%s6175_s29 + $0x270] sm:$0xff]   ;;  %v5249_v19 = vld [vmem:[%s6175_s29 + $0x278] sm:$0xff]  }
 0x917   : > { %v2471_v24 = vadd.f32 %v2470_v22, %v1655_v10  ;;  %v2512_v25 = vadd.f32 %v2511_v23, %v1663_v11  ;;  %v2472_v27 = vpop.f32.mrb[34].mxu1  ;;  %v2513_v13 = vpop.f32.mrb[22].mxu0  ;;  %4763 = vmatpush3.bf16.msra.mxu1 %v5215_v12  ;;  %4785 = vmatpush3.bf16.msra.mxu0 %v5216_v15  ;;  %v6622_v51 = vld [vmem:[%s6193_s5 + $0x8] sm:$0xff]  ;;  %v5246_v10 = vld [vmem:[%s6175_s29 + $0x2f0] sm:$0xff]  }
 0x918   : > { %v2684_v32 = vmax.f32 %v2469_v20, 0.0  ;;  %v2686_v36 = vmax.f32 %v2510_v21, 0.0  ;;  %v2473_v37 = vpop.f32.mrb[35].mxu1  ;;  %v2514_v38 = vpop.f32.mrb[23].mxu0  ;;  %4764 = vmatprep.subr.bf16.mxu1 %v5217_v16  ;;  %4786 = vmatprep.subr.bf16.mxu0 %v5218_v17  ;;  %v1667_v11 = vrot.slane %v6622_v51, %v6247_v33  ;;  %v1675_v12 = vrot.slane %v6622_v51, %v6263_v45  ;;  %v5247_v17 = vld [vmem:[%s6175_s29 + $0x230] sm:$0xff]   ;;  %v5250_v20 = vld [vmem:[%s6175_s29 + $0x2f8] sm:$0xff]  }
 0x919   : > { %v2685_v39 = vmax.f32 %v2471_v24, 0.0  ;;  %v2687_v40 = vmax.f32 %v2512_v25, 0.0  ;;  %v1671_v15 = vrot.slane %v6622_v51, %v6243_v31  ;;  %v1679_v16 = vrot.slane %v6622_v51, %v6539_v14  ;;  %v5248_v18 = vld [vmem:[%s6175_s29 + $0x2b0] sm:$0xff]  }
 0x91a   : > { %v2700_v46 = vpack.c.bf16 %v2684_v32, %v2684_v32  ;;  %v2702_v47 = vpack.c.bf16 %v2686_v36, %v2686_v36 }
 0x91b   : > { %v2701_v41 = vpack.c.bf16 %v2685_v39, %v2685_v39  ;;  %v2703_v42 = vpack.c.bf16 %v2687_v40, %v2687_v40  ;;  %4765 = vmatpush3.bf16.msra.mxu1 %v5219_v28  ;;  %4787 = vmatpush3.bf16.msra.mxu0 %v5220_v29  ;;  %v5251_v28 = vld [vmem:[%s6175_s29 + $0x238] sm:$0xff]  }
 0x91c   : > { %4794 = vmatprep.subr.bf16.mxu1 %v5221_v54  ;;  %4816 = vmatprep.subr.bf16.mxu0 %v5222_v26  ;;  %v5252_v29 = vld [vmem:[%s6175_s29 + $0x2b8] sm:$0xff]   ;;  %v5253_v54 = vld [vmem:[%s6175_s29 + $0x340] sm:$0xff]  }
 0x91d   : > { %3852 = vmatprep.mubr.bf16.mxu1 %v2701_v41  ;;  %3892 = vmatprep.mubr.bf16.mxu0 %v2703_v42  ;;  %v5254_v26 = vld [vmem:[%s6175_s29 + $0x3c0] sm:$0xff]  }
 0x91e   : > { %3853 = vmatmul.mubr.bf16.vlgmr.msra.gmra.mrb[48].mxu1 %v2700_v46  ;;  %3893 = vmatmul.mubr.bf16.vlgmr.msra.gmra.mrb[36].mxu0 %v2702_v47 }
 0x91f   : > { %4795 = vmatpush3.bf16.msra.mxu1 %v5223_v43  ;;  %4817 = vmatpush3.bf16.msra.mxu0 %v5224_v44  ;;  %v5255_v43 = vld [vmem:[%s6175_s29 + $0x300] sm:$0xff]  }
 0x920   : > { %4796 = vmatprep.subr.bf16.mxu1 %v5225_v48  ;;  %4818 = vmatprep.subr.bf16.mxu0 %v5226_v4  ;;  %v5256_v44 = vld [vmem:[%s6175_s29 + $0x380] sm:$0xff]   ;;  %v5257_v48 = vld [vmem:[%s6175_s29 + $0x348] sm:$0xff]  }
 0x921   : > { %v5258_v4 = vld [vmem:[%s6175_s29 + $0x3c8] sm:$0xff]  }
 0x923   : > { %4797 = vmatpush3.bf16.msra.mxu1 %v5227_v49  ;;  %4819 = vmatpush3.bf16.msra.mxu0 %v5228_v50  ;;  %v5259_v49 = vld [vmem:[%s6175_s29 + $0x308] sm:$0xff]  }
 0x924   : > { %4798 = vmatprep.subr.bf16.mxu1 %v5229_v52  ;;  %4820 = vmatprep.subr.bf16.mxu0 %v5230_v53  ;;  %v5260_v50 = vld [vmem:[%s6175_s29 + $0x388] sm:$0xff]   ;;  %v5261_v52 = vld [vmem:[%s6175_s29 + $0x350] sm:$0xff]  }
 0x925   : > { %v5262_v53 = vld [vmem:[%s6175_s29 + $0x3d0] sm:$0xff]  }
 0x927   : > { %4799 = vmatpush3.bf16.msra.mxu1 %v5231_v55  ;;  %4821 = vmatpush3.bf16.msra.mxu0 %v5232_v35  ;;  %v5263_v55 = vld [vmem:[%s6175_s29 + $0x310] sm:$0xff]  }
 0x928   : > { %4800 = vmatprep.subr.bf16.mxu1 %v5233_v56  ;;  %4822 = vmatprep.subr.bf16.mxu0 %v5234_v57  ;;  %v5264_v35 = vld [vmem:[%s6175_s29 + $0x390] sm:$0xff]   ;;  %v5265_v56 = vld [vmem:[%s6175_s29 + $0x358] sm:$0xff]  }
 0x929   : > { %v5266_v57 = vld [vmem:[%s6175_s29 + $0x3d8] sm:$0xff]  }
 0x92b   : > { %4801 = vmatpush3.bf16.msra.mxu1 %v5235_v58  ;;  %4823 = vmatpush3.bf16.msra.mxu0 %v5236_v59  ;;  %v5267_v58 = vld [vmem:[%s6175_s29 + $0x318] sm:$0xff]  }
 0x92c   : > { %4802 = vmatprep.subr.bf16.mxu1 %v5237_v60  ;;  %4824 = vmatprep.subr.bf16.mxu0 %v5238_v61  ;;  %v5268_v59 = vld [vmem:[%s6175_s29 + $0x398] sm:$0xff]   ;;  %v5269_v60 = vld [vmem:[%s6175_s29 + $0x360] sm:$0xff]  }
 0x92d   : > { %v5270_v61 = vld [vmem:[%s6175_s29 + $0x3e0] sm:$0xff]  }
 0x92f   : > { %4803 = vmatpush3.bf16.msra.mxu1 %v5239_v62  ;;  %4825 = vmatpush3.bf16.msra.mxu0 %v5240_v63  ;;  %v5271_v62 = vld [vmem:[%s6175_s29 + $0x320] sm:$0xff]  }
 0x930   : > { %4804 = vmatprep.subr.bf16.mxu1 %v5241_v2  ;;  %4826 = vmatprep.subr.bf16.mxu0 %v5242_v5  ;;  %v5272_v63 = vld [vmem:[%s6175_s29 + $0x3a0] sm:$0xff]   ;;  %v5273_v2 = vld [vmem:[%s6175_s29 + $0x368] sm:$0xff]  }
 0x931   : > { %v5274_v5 = vld [vmem:[%s6175_s29 + $0x3e8] sm:$0xff]  }
 0x933   : > { %4805 = vmatpush3.bf16.msra.mxu1 %v5243_v8  ;;  %4827 = vmatpush3.bf16.msra.mxu0 %v5244_v9  ;;  %v5275_v8 = vld [vmem:[%s6175_s29 + $0x328] sm:$0xff]  }
 0x934   : > { %4806 = vmatprep.subr.bf16.mxu1 %v5245_v3  ;;  %4828 = vmatprep.subr.bf16.mxu0 %v5246_v10  ;;  %v5276_v9 = vld [vmem:[%s6175_s29 + $0x3a8] sm:$0xff]   ;;  %v5277_v3 = vld [vmem:[%s6175_s29 + $0x370] sm:$0xff]  }
 0x935   : > { %v2550_v33 = vpop.f32.mrb[36].mxu1  ;;  %v2591_v21 = vpop.f32.mrb[24].mxu0  ;;  %v5278_v10 = vld [vmem:[%s6175_s29 + $0x3f0] sm:$0xff]  }
 0x936   : > { %v2551_v22 = vadd.f32 %v2550_v33, %v1667_v11  ;;  %v2592_v45 = vadd.f32 %v2591_v21, %v1675_v12  ;;  %v2552_v23 = vpop.f32.mrb[37].mxu1  ;;  %v2593_v24 = vpop.f32.mrb[25].mxu0  ;;  %v1683_v11 = vrot.slane %v6622_v51, %v6570_v0  ;;  %v1691_v12 = vrot.slane %v6622_v51, %v1658_v1 }
 0x937   : > { %v2553_v31 = vadd.f32 %v2552_v23, %v1671_v15  ;;  %v2594_v25 = vadd.f32 %v2593_v24, %v1679_v16  ;;  %v2554_v27 = vpop.f32.mrb[38].mxu1  ;;  %v2595_v13 = vpop.f32.mrb[26].mxu0  ;;  %4807 = vmatpush3.bf16.msra.mxu1 %v5247_v17  ;;  %4829 = vmatpush3.bf16.msra.mxu0 %v5248_v18  ;;  %v1687_v15 = vrot.slane %v6622_v51, %v6576_v6  ;;  %v5279_v17 = vld [vmem:[%s6175_s29 + $0x330] sm:$0xff]  }
 0x938   : > { %v2688_v32 = vmax.f32 %v2551_v22, 0.0  ;;  %v2690_v36 = vmax.f32 %v2592_v45, 0.0  ;;  %v2555_v37 = vpop.f32.mrb[39].mxu1  ;;  %v2596_v38 = vpop.f32.mrb[27].mxu0  ;;  %4808 = vmatprep.subr.bf16.mxu1 %v5249_v19  ;;  %4830 = vmatprep.subr.bf16.mxu0 %v5250_v20  ;;  %v1695_v16 = vrot.slane %v6622_v51, %v1662_v7  ;;  %v5280_v18 = vld [vmem:[%s6175_s29 + $0x3b0] sm:$0xff]   ;;  %v5281_v19 = vld [vmem:[%s6175_s29 + $0x378] sm:$0xff]  }
 0x939   : > { %v2689_v39 = vmax.f32 %v2553_v31, 0.0  ;;  %v2691_v40 = vmax.f32 %v2594_v25, 0.0  ;;  %v5282_v20 = vld [vmem:[%s6175_s29 + $0x3f8] sm:$0xff]  }
 0x93a   : > { %v2704_v46 = vpack.c.bf16 %v2688_v32, %v2688_v32  ;;  %v2706_v47 = vpack.c.bf16 %v2690_v36, %v2690_v36  ;;  %v5283_v7 = vld [vmem:[%s6175_s29 + $0x338] sm:$0xff]  }
 0x93b   : > { %v2705_v41 = vpack.c.bf16 %v2689_v39, %v2689_v39  ;;  %v2707_v42 = vpack.c.bf16 %v2691_v40, %v2691_v40  ;;  %4809 = vmatpush3.bf16.msra.mxu1 %v5251_v28  ;;  %4831 = vmatpush3.bf16.msra.mxu0 %v5252_v29  ;;  %v5284_v51 = vld [vmem:[%s6175_s29 + $0x3b8] sm:$0xff]  }
 0x93c   : > { %4838 = vmatprep.subr.bf16.mxu1 %v5253_v54  ;;  %4860 = vmatprep.subr.bf16.mxu0 %v5254_v26 }
 0x93d   : > { %3932 = vmatprep.mubr.bf16.mxu1 %v2705_v41  ;;  %3972 = vmatprep.mubr.bf16.mxu0 %v2707_v42  ;;  %v6683_v41 = vld [vmem:[%s6186_s15] sm:$0xff] }
 0x93e   : > { %3933 = vmatmul.mubr.bf16.vlgmr.msra.gmra.mrb[52].mxu1 %v2704_v46  ;;  %3973 = vmatmul.mubr.bf16.vlgmr.msra.gmra.mrb[40].mxu0 %v2706_v47  ;;  %v2971_v42 = vrot.slane %v6683_v41, %v6539_v14 }
 0x93f   : > { %4839 = vmatpush3.bf16.msra.mxu1 %v5255_v43  ;;  %4861 = vmatpush3.bf16.msra.mxu0 %v5256_v44 }
 0x940   : > { %4840 = vmatprep.subr.bf16.mxu1 %v5257_v48  ;;  %4862 = vmatprep.subr.bf16.mxu0 %v5258_v4 }
 0x943   : > { %4841 = vmatpush3.bf16.msra.mxu1 %v5259_v49  ;;  %4863 = vmatpush3.bf16.msra.mxu0 %v5260_v50 }
 0x944   : > { %4842 = vmatprep.subr.bf16.mxu1 %v5261_v52  ;;  %4864 = vmatprep.subr.bf16.mxu0 %v5262_v53 }
 0x947   : > { %4843 = vmatpush3.bf16.msra.mxu1 %v5263_v55  ;;  %4865 = vmatpush3.bf16.msra.mxu0 %v5264_v35 }
 0x948   : > { %4844 = vmatprep.subr.bf16.mxu1 %v5265_v56  ;;  %4866 = vmatprep.subr.bf16.mxu0 %v5266_v57 }
 0x94b   : > { %4845 = vmatpush3.bf16.msra.mxu1 %v5267_v58  ;;  %4867 = vmatpush3.bf16.msra.mxu0 %v5268_v59 }
 0x94c   : > { %4846 = vmatprep.subr.bf16.mxu1 %v5269_v60  ;;  %4868 = vmatprep.subr.bf16.mxu0 %v5270_v61 }
 0x94f   : > { %4847 = vmatpush3.bf16.msra.mxu1 %v5271_v62  ;;  %4869 = vmatpush3.bf16.msra.mxu0 %v5272_v63 }
 0x950   : > { %4848 = vmatprep.subr.bf16.mxu1 %v5273_v2  ;;  %4870 = vmatprep.subr.bf16.mxu0 %v5274_v5 }
 0x953   : > { %4849 = vmatpush3.bf16.msra.mxu1 %v5275_v8  ;;  %4871 = vmatpush3.bf16.msra.mxu0 %v5276_v9 }
 0x954   : > { %4850 = vmatprep.subr.bf16.mxu1 %v5277_v3  ;;  %4872 = vmatprep.subr.bf16.mxu0 %v5278_v10 }
 0x955   : > { %v2632_v33 = vpop.f32.mrb[40].mxu1  ;;  %v2673_v21 = vpop.f32.mrb[28].mxu0 }
 0x956   : > { %v2633_v1 = vadd.f32 %v2632_v33, %v1683_v11  ;;  %v2674_v22 = vadd.f32 %v2673_v21, %v1691_v12  ;;  %v2634_v45 = vpop.f32.mrb[41].mxu1  ;;  %v2675_v23 = vpop.f32.mrb[29].mxu0 }
 0x957   : > { %v2635_v24 = vadd.f32 %v2634_v45, %v1687_v15  ;;  %v2676_v31 = vadd.f32 %v2675_v23, %v1695_v16  ;;  %v2636_v25 = vpop.f32.mrb[42].mxu1  ;;  %v2677_v30 = vpop.f32.mrb[30].mxu0  ;;  %4851 = vmatpush3.bf16.msra.mxu1 %v5279_v17  ;;  %4873 = vmatpush3.bf16.msra.mxu0 %v5280_v18 }
 0x958   : > { %v2692_v27 = vmax.f32 %v2633_v1, 0.0  ;;  %v2694_v13 = vmax.f32 %v2674_v22, 0.0  ;;  %v2637_v28 = vpop.f32.mrb[43].mxu1  ;;  %v2678_v29 = vpop.f32.mrb[31].mxu0  ;;  %4852 = vmatprep.subr.bf16.mxu1 %v5281_v19  ;;  %4874 = vmatprep.subr.bf16.mxu0 %v5282_v20 }
 0x959   : > { %v2693_v32 = vmax.f32 %v2635_v24, 0.0  ;;  %v2695_v36 = vmax.f32 %v2676_v31, 0.0 }
 0x95a   : > { %v2708_v54 = vpack.c.bf16 %v2692_v27, %v2692_v27  ;;  %v2710_v26 = vpack.c.bf16 %v2694_v13, %v2694_v13 }
 0x95b   : > { %v2709_v37 = vpack.c.bf16 %v2693_v32, %v2693_v32  ;;  %v2711_v38 = vpack.c.bf16 %v2695_v36, %v2695_v36  ;;  %4853 = vmatpush3.bf16.msra.mxu1 %v5283_v7  ;;  %4875 = vmatpush3.bf16.msra.mxu0 %v5284_v51 }
 0x95d   : > { %4012 = vmatprep.mubr.bf16.mxu1 %v2709_v37  ;;  %4052 = vmatprep.mubr.bf16.mxu0 %v2711_v38  ;;  %v4075_v38 = vrot.slane %v6683_v41, %v6570_v0 }
 0x95e   : > { %4013 = vmatmul.mubr.bf16.vlgmr.msra.gmra.mrb[56].mxu1 %v2708_v54  ;;  %4053 = vmatmul.mubr.bf16.vlgmr.msra.gmra.mrb[44].mxu0 %v2710_v26  ;;  %v4080_v26 = vrot.slane %v6683_v41, %v6576_v6 }
 0x9d1   : > { %v4722_v39 = vpop.f32.mrb[44].mxu1  ;;  %v4744_v40 = vpop.f32.mrb[32].mxu0 }
 0x9d2   : > { %v4723_v43 = vpop.f32.mrb[45].mxu1  ;;  %v4745_v44 = vpop.f32.mrb[33].mxu0 }
 0x9d3   : > { %v4724_v46 = vadd.f32 %v4723_v43, %v4722_v39  ;;  %v4746_v47 = vadd.f32 %v4745_v44, %v4744_v40  ;;  %v4725_v48 = vpop.f32.mrb[46].mxu1  ;;  %v4747_v4 = vpop.f32.mrb[34].mxu0 }
 0x9d4   : > { %v4726_v49 = vpop.f32.mrb[47].mxu1  ;;  %v4748_v50 = vpop.f32.mrb[35].mxu0 }
 0x9d5   : > { %v3775_v52 = vadd.f32 %v4724_v46, %v2971_v42 }
 0x9d7   : > { %v3815_v53 = vadd.f32 %v4746_v47, %v3775_v52 }
 0x9f1   : > { %v4766_v55 = vpop.f32.mrb[48].mxu1  ;;  %v4788_v35 = vpop.f32.mrb[36].mxu0 }
 0x9f2   : > { %v4767_v56 = vpop.f32.mrb[49].mxu1  ;;  %v4789_v57 = vpop.f32.mrb[37].mxu0 }
 0x9f3   : > { %v4768_v58 = vadd.f32 %v4767_v56, %v4766_v55  ;;  %v4790_v59 = vadd.f32 %v4789_v57, %v4788_v35  ;;  %v4769_v60 = vpop.f32.mrb[50].mxu1  ;;  %v4791_v61 = vpop.f32.mrb[38].mxu0 }
 0x9f4   : > { %v4770_v62 = vpop.f32.mrb[51].mxu1  ;;  %v4792_v14 = vpop.f32.mrb[39].mxu0 }
 0x9f5   : > { %v3855_v63 = vadd.f32 %v4768_v58, %v3815_v53 }
 0x9f7   : > { %v3895_v2 = vadd.f32 %v4790_v59, %v3855_v63 }
 0xa11   : > { %v4810_v5 = vpop.f32.mrb[52].mxu1  ;;  %v4832_v8 = vpop.f32.mrb[40].mxu0 }
 0xa12   : > { %v4811_v9 = vpop.f32.mrb[53].mxu1  ;;  %v4833_v3 = vpop.f32.mrb[41].mxu0 }
 0xa13   : > { %v4812_v10 = vadd.f32 %v4811_v9, %v4810_v5  ;;  %v4834_v11 = vadd.f32 %v4833_v3, %v4832_v8  ;;  %v4813_v12 = vpop.f32.mrb[54].mxu1  ;;  %v4835_v15 = vpop.f32.mrb[42].mxu0 }
 0xa14   : > { %v4814_v16 = vpop.f32.mrb[55].mxu1  ;;  %v4836_v17 = vpop.f32.mrb[43].mxu0 }
 0xa15   : > { %v3935_v18 = vadd.f32 %v4812_v10, %v3895_v2 }
 0xa17   : > { %v3975_v19 = vadd.f32 %v4834_v11, %v3935_v18 }
 0xa31   : > { %v4854_v20 = vpop.f32.mrb[56].mxu1  ;;  %v4876_v33 = vpop.f32.mrb[44].mxu0 }
 0xa32   : > { %v4855_v21 = vpop.f32.mrb[57].mxu1  ;;  %v4877_v1 = vpop.f32.mrb[45].mxu0 }
 0xa33   : > { %v4856_v22 = vadd.f32 %v4855_v21, %v4854_v20  ;;  %v4878_v45 = vadd.f32 %v4877_v1, %v4876_v33  ;;  %v4857_v23 = vpop.f32.mrb[58].mxu1  ;;  %v4879_v24 = vpop.f32.mrb[46].mxu0 }
 0xa34   : > { %v4858_v31 = vpop.f32.mrb[59].mxu1  ;;  %v4880_v25 = vpop.f32.mrb[47].mxu0 }
 0xa35   : > { %v4015_v30 = vadd.f32 %v4856_v22, %v3975_v19 }
 0xa37   : > { %v4055_v7 = vadd.f32 %v4878_v45, %v4015_v30 }
 0xa39   : > { %v4060_v51 = vadd.f32 %v4055_v7, %v6393_v34 }
 0xa3b   : > { %4061 = vadd.xlane.f32.xlu0 %v4060_v51 }
 0xac8   : > { %v4062_v27 = vpop.xlane.xlu0 %4061 }
 0xac9   : > { %v4063_v13 = vmul.f32 0.0078125, %v4062_v27 }
 0xacb   : > { %v4064_v28 = vsub.f32 %v4060_v51, %v4063_v13 }
 0xacd   : > { %v4065_v29 = vmul.f32 %v4064_v28, %v4064_v28 }
 0xacf   : > { %4066 = vadd.xlane.f32.xlu0 %v4065_v29 }
 0xb5c   : > { %v4067_v32 = vpop.xlane.xlu0 %4066 }
 0xb5d   : > { %v4068_v36 = vmul.f32 0.0078125, %v4067_v32 }
 0xb5f   : > { %v4069_v37 = vadd.f32 1e-05, %v4068_v36 }
 0xb61   : > { %5303 = vrsqrt.f32 %v4069_v37 }
 0xb6b   : > { %v5304_v54 = vpop.eup %5303 }
 0xb6c   : > { %v4071_v39 = vmul.f32 %v5304_v54, %v4064_v28  ;;  %4086 = sbr.rel (%p4663_p2) target bundleno = 2931 (0xb73), region = 92 }
 0xb6e   : > { %v4076_v40 = vmul.f32 %v4075_v38, %v4071_v39 }
 0xb70   : > { %v4081_v34 = vadd.f32 %v4080_v26, %v4076_v40 }
 0xb72   : > { %4082 = vst [vmem:[#allocation2] sm:$0xff] %v4081_v34  ;;  %4087 = vst [vmem:[%s611_s27] sm:$0xff] (!%p4663_p2), %v4081_v34 }
 0xb73 PF: > { %s6862_s22 = sld [smem:[#allocation27_spill]]  ;;  %s6863_s7 = sld [smem:[#allocation36_spill]] }
 0xb74   : > { %s6864_s19 = sld [smem:[#allocation44_spill]]  ;;  %s4102_s9 = sshll.u32 %s611_s27, 4  ;;  %s4103_s9 = int_to_ptr.vmem [resolvable:$true] %s4102_s9 }
 0xb75   : > { %s4089_s24 = scalar_lea.sflag [#allocation5], %s6143_s23  ;;  %s5517_s21 = scalar_lea.vmem %s4103_s9, 128 }
 0xb76   : > { %p5518_p6 = scmp.ne.s32.totalorder %s4103_s9, %s5517_s21  ;;  %s5675_s15 = smov [#allocation15]  }
 0xb77   : > { %s5521_s30 = sshll.u32 %s5675_s15, 4  ;;  %s5522_s30 = int_to_ptr.vmem [resolvable:$false] %s5521_s30 }
 0xb78   : > { %s5523_s11 = scalar_lea.vmem %s5522_s30, 256  ;;  %p5524_p12 = scmp.lt.s32.totalorder %s4103_s9, %s5522_s30 }
 0xb79   : > { %s4665_s29 = sshll.u32 %s6862_s22, 7  ;;  %p6866_p3 = scmp.ne.s32.totalorder %s6863_s7, 0 }
 0xb7a   : > { %s6865_s1 = smov %s6864_s19  ;;  %s6699_s13 = scalar_lea.hbm %s6864_s19, %s4665_s29 }
 0xb7b   : > { %p5519_p7 = pnand %p5518_p6, %p6866_p3  ;;  %p5525_p11 = scmp.lt.s32.totalorder %s5523_s11, %s5517_s21 }
 0xb7d   : > { %p5520_p10 = pneg %p5519_p7  ;;  %p5526_p4 = por %p5525_p11, %p5524_p12 }
 0xb7f   : > { %p5527_p9 = pnand %p5526_p4, %p5520_p10 }
 0xb81   : > { %5530 = shalt.err (!%p5527_p9)
}
 0xb82   : > { %s5531_s23 = scalar_lea.hbm %s6699_s13, 128  ;;  %s5535_s10 = scalar_lea.hbm %s6865_s1, 256 }
 0xb83   : > { %p5532_p8 = scmp.ne.s32.totalorder %s6699_s13, %s5531_s23  ;;  %p5536_p1 = scmp.lt.u32.totalorder %s6699_s13, %s6865_s1 }
 0xb84   : > { %p5537_p13 = scmp.lt.u32.totalorder %s5535_s10, %s5531_s23  ;;  %p5539_p6 = scmp.lt.u32.totalorder %s5531_s23, %s6699_s13 }
 0xb85   : > { %p5533_p5 = pnand %p5532_p8, %p6866_p3 }
 0xb86   : > { %p5538_p2 = por %p5537_p13, %p5536_p1 }
 0xb87   : > { %p5534_p0 = pneg %p5533_p5 }
 0xb88   : > { %p5540_p7 = por %p5539_p6, %p5538_p2 }
 0xb8a   : > { %p5541_p10 = pnand %p5540_p7, %p5534_p0 }
 0xb8c   : > { %5544 = shalt.err (!%p5541_p10)
}
 0xb8d   : > { %4988 = dma.vmem_to_hbm [thread:$0]  (%p6866_p3), %s4103_s9, 128, %s6699_s13, %s4089_s24  }
 0xb8e PF: > { %s6867_s16 = sld [smem:[#allocation28_spill]]  ;;  %s6868_s6 = sld [smem:[#allocation24_spill]] }
 0xb8f   : > { %s6869_s26 = sld [smem:[#allocation37_spill]] }
 0xb94   : > { %p5017_p12 = scmp.ge.s32.totalorder %s6867_s16, 2  ;;  %s4114_s28 = sand.u32 1, %s6868_s6  }
 0xb95   : > { %p6870_p11 = scmp.ne.s32.totalorder %s6869_s26, 0  ;;  %s4115_s22 = scalar_lea.sflag [#allocation5], %s4114_s28 }
 0xb97   : > { %p5013_p4 = pnand %p5017_p12, %p6870_p11 }
 0xb99   : > { %5610 = dma.done.wait (!%p5013_p4), %s4115_s22, 128  }
 0xb9a   : > { %5612 = vsyncadd (!%p5013_p4), %s4115_s22, 4294967168  ;;  %s34_s19 = sadd.s32 1, %s6867_s16   ;;  %s6871_s30 = sld [smem:[#allocation22_spill]] }
 0xb9b   : > { %p31_p9 = scmp.ge.s32.totalorder %s34_s19, 6   ;;  %s6872_s10 = sld [smem:[#allocation23_spill]] }
 0xb9c   : > { %s6873_s11 = sld [smem:[#allocation33_spill]]  ;;  %s6874_s12 = sld [smem:[#allocation25_spill]] }
 0xb9d   : > { %s6875_s7 = sld [smem:[#allocation34_spill]]  ;;  %s6876_s29 = sld [smem:[#allocation30_spill]] }
 0xb9e   : > { %s6877_s25 = sld [smem:[#allocation31_spill]]  ;;  %s6878_s13 = smov %s5635_s14 }
 0xb9f   : > { %s6880_s15 = smov %s5647_s17  ;;  %s6881_s16 = smov %s5651_s18 }
 0xba0   :  { %33 = sbr.rel (!%p31_p9) target bundleno = 22 (0x16), region = 187 }
 0xba3   : > { %s6879_s14 = smov %s6875_s7  ;;  %s6882_s17 = smov %s6876_s29 }
 0xba4   : > { %s6883_s18 = smov %s6877_s25 }
 0xba7   :  { %4120 = vsyncpa [#allocation4], 1 }
 0xba8   :  { %4122 = vsyncpa [#allocation4 + $0x1], 1 }
 0xba9   :  { %4123 = vsyncpa [#allocation7], 1 }
 0xbaa   :  { %4125 = vsyncpa [#allocation7 + $0x1], 1 }
 0xbab   :  { %4126 = vsyncpa [#allocation10], 1 }
 0xbac   :  { %4128 = vsyncpa [#allocation10 + $0x1], 1 }
 0xbad   :  { %4129 = vsyncpa [#allocation13], 1 }
 0xbae   :  { %4131 = vsyncpa [#allocation13 + $0x1], 1 }
 0xbaf   :  { %4132 = vsyncpa [#allocation5], 1 }
 0xbb0   :  { %4134 = vsyncpa [#allocation5 + $0x1], 1 }

</bundles_post_ra>
